<compile_context>
chip_gen: v7x
topology: tpu7x:2x2x1
jax: 0.10.0
libtpu: 0.0.40
codegen_flags: <defaults>
</compile_context>

<pallas_src>
import jax
import jax.numpy as jnp
from jax.experimental import pallas as pl
from jax.experimental.pallas import tpu as pltpu

BN_EPS = 1e-5


def _vmem_limit_bytes():
    """Generation-aware scoped-VMEM budget (3/4 of physical, capped at 96 MiB)."""
    cap = 64 << 20
    try:
        info = pltpu.get_tpu_info()
        cap = int(getattr(info, "vmem_capacity_bytes", cap))
    except Exception:
        pass
    return min(cap * 3 // 4, 96 << 20)


def _tap_masks(H, W):
    """(9, 1, H*W) validity masks: tap (kh,kw) contributes at flat position
    i*W+j iff the source pixel (i+kh-1, j+kw-1) is inside the image."""
    ii = jnp.arange(H).reshape(H, 1)
    jj = jnp.arange(W).reshape(1, W)
    rows = []
    for kh in range(3):
        for kw in range(3):
            dh, dw = kh - 1, kw - 1
            ok = (ii + dh >= 0) & (ii + dh < H) & (jj + dw >= 0) & (jj + dw < W)
            rows.append(ok.reshape(1, H * W))
    return jnp.stack(rows, axis=0).astype(jnp.float32)


def _make_conv_kernel(H, W, apply_input_act):
    """[optional fused BN+ReLU on input] + Conv3x3(pad=1, no bias) + BN stats.

    Operates entirely on the lane-dense flattened (C, H*W) representation:
    9 accumulated MXU matmuls over lane-shifted, mask-zeroed views.
    """
    HW = H * W
    taps = [(kh - 1, kw - 1) for kh in range(3) for kw in range(3)]

    def kernel(x_ref, w_ref, m_ref, scale_ref, shift_ref, y_ref, stats_ref):
        act = x_ref[0].astype(jnp.float32)                       # (Cin, HW)
        if apply_input_act:
            # Previous layer's BN + ReLU applied on the fly (per-channel affine).
            act = jnp.maximum(act * scale_ref[...] + shift_ref[...], 0.0)

        cout = w_ref.shape[1]
        acc = jnp.zeros((cout, HW), jnp.float32)
        for t, (dh, dw) in enumerate(taps):
            d = dh * W + dw
            if d == 0:
                shifted = act
            else:
                # shifted[p] == act[p + d]  (wrapped positions are masked to 0,
                # which exactly reproduces the conv's zero padding).
                shifted = jnp.concatenate([act[:, d:], act[:, :d]], axis=1)
            shifted = (shifted * m_ref[t]).astype(jnp.bfloat16)  # (Cin, HW)
            acc = acc + jnp.dot(w_ref[t], shifted,
                                preferred_element_type=jnp.float32)

        # Lane-dense store of the raw conv output (bf16 for the intermediate).
        y_ref[...] = acc[None].astype(y_ref.dtype)

        # Per-image BN batch statistics from the f32 accumulator.
        stats_ref[...] = jnp.concatenate(
            [jnp.sum(acc, axis=1, keepdims=True),
             jnp.sum(acc * acc, axis=1, keepdims=True)], axis=1)[None]

    return kernel


def _conv_layer(x_flat, w_taps, masks, scale_in, shift_in, *, height, width,
                apply_input_act, out_dtype):
    """One conv layer: returns raw conv output (N, Cout, H*W) + per-image stats."""
    N, Cin, HW = x_flat.shape
    Cout = w_taps.shape[1]
    kernel = _make_conv_kernel(height, width, apply_input_act)
    y, stats = pl.pallas_call(
        kernel,
        grid=(N,),
        in_specs=[
            pl.BlockSpec((1, Cin, HW), lambda n: (n, 0, 0)),      # activation slab
            pl.BlockSpec((9, Cout, Cin), lambda n: (0, 0, 0)),    # per-tap weights (bf16)
            pl.BlockSpec((9, 1, HW), lambda n: (0, 0, 0)),        # tap validity masks
            pl.BlockSpec((Cin, 1), lambda n: (0, 0)),             # fused BN scale
            pl.BlockSpec((Cin, 1), lambda n: (0, 0)),             # fused BN shift
        ],
        out_specs=[
            pl.BlockSpec((1, Cout, HW), lambda n: (n, 0, 0)),
            pl.BlockSpec((1, Cout, 2), lambda n: (n, 0, 0)),
        ],
        out_shape=[
            jax.ShapeDtypeStruct((N, Cout, HW), out_dtype),
            jax.ShapeDtypeStruct((N, Cout, 2), jnp.float32),
        ],
        compiler_params=pltpu.CompilerParams(
            dimension_semantics=("parallel",),       # batch sharded on v7x megacore
            vmem_limit_bytes=_vmem_limit_bytes(),
        ),
    )(x_flat, w_taps, masks, scale_in, shift_in)
    return y, stats


def _bn_relu_kernel(y_ref, scale_ref, shift_ref, o_ref):
    y = y_ref[0].astype(jnp.float32)                              # (C, HW)
    o_ref[...] = jnp.maximum(y * scale_ref[...] + shift_ref[...],
                             0.0)[None].astype(o_ref.dtype)


def _bn_relu(y_flat, scale, shift):
    """Final BN(affine)+ReLU: one full (C, H*W) lane-dense block per image."""
    N, C, HW = y_flat.shape
    return pl.pallas_call(
        _bn_relu_kernel,
        grid=(N,),
        in_specs=[
            pl.BlockSpec((1, C, HW), lambda n: (n, 0, 0)),
            pl.BlockSpec((C, 1), lambda n: (0, 0)),
            pl.BlockSpec((C, 1), lambda n: (0, 0)),
        ],
        out_specs=pl.BlockSpec((1, C, HW), lambda n: (n, 0, 0)),
        out_shape=jax.ShapeDtypeStruct((N, C, HW), jnp.float32),
        compiler_params=pltpu.CompilerParams(
            dimension_semantics=("parallel",),
            vmem_limit_bytes=_vmem_limit_bytes(),
        ),
    )(y_flat, scale, shift)


def _bn_scale_shift(stats, gamma, beta, count):
    """Finalize BN batch stats (biased variance, clamped >= 0) to scale/shift."""
    s = jnp.sum(stats.astype(jnp.float32), axis=0)                # (C, 2)
    mean = s[:, 0] / count
    var = jnp.maximum(s[:, 1] / count - mean * mean, 0.0)
    scale = gamma * jax.lax.rsqrt(var + BN_EPS)
    shift = beta - mean * scale
    return (scale.reshape(-1, 1).astype(jnp.float32),
            shift.reshape(-1, 1).astype(jnp.float32))


@jax.jit
def c2_forward(x_nchw, params):
    """C2.forward: Conv3x3->BN->ReLU -> Conv3x3->BN->ReLU, NCHW in/out."""
    x = x_nchw.astype(jnp.float32)
    N, Cin, H, W = x.shape
    HW = H * W
    w1, w2 = params["w1"], params["w2"]                 # PyTorch OIHW layout
    C1, C2 = w1.shape[0], w2.shape[0]
    count = float(N * H * W)

    # Per-tap weight slabs (9, Cout, Cin), bf16 for the MXU.
    w1t = jnp.transpose(w1, (2, 3, 0, 1)).reshape(9, C1, Cin).astype(jnp.bfloat16)
    w2t = jnp.transpose(w2, (2, 3, 0, 1)).reshape(9, C2, C1).astype(jnp.bfloat16)
    masks = _tap_masks(H, W)                            # (9, 1, HW) f32, precomputed

    # Lane-dense flattened input (free reshape, no padding anywhere).
    x_flat = x.reshape(N, Cin, HW)

    # Layer 1: conv on raw input; collect BN1 batch stats; store y1 in bf16.
    y1, st1 = _conv_layer(x_flat, w1t, masks,
                          jnp.ones((Cin, 1), jnp.float32),
                          jnp.zeros((Cin, 1), jnp.float32),
                          height=H, width=W,
                          apply_input_act=False, out_dtype=jnp.bfloat16)
    s1, b1 = _bn_scale_shift(st1, params["gamma1"], params["beta1"], count)

    # Layer 2: BN1+ReLU1 fused into the conv kernel's input path (no extra
    # HBM pass over y1), collect BN2 batch stats.
    y2, st2 = _conv_layer(y1, w2t, masks, s1, b1,
                          height=H, width=W,
                          apply_input_act=True, out_dtype=jnp.float32)
    s2, b2 = _bn_scale_shift(st2, params["gamma2"], params["beta2"], count)

    # Final BN2 + ReLU2.
    out = _bn_relu(y2, s2, b2)
    return out.reshape(N, C2, H, W)


def init_c2_params(key, in_channels, out_channels):
    """Deterministic params with PyTorch Conv2d / BatchNorm2d shapes."""
    k1, k2, k3, k4 = jax.random.split(key, 4)
    return {
        "w1": jax.random.normal(k1, (out_channels, in_channels, 3, 3), jnp.float32) * 0.1,
        "w2": jax.random.normal(k2, (out_channels, out_channels, 3, 3), jnp.float32) * 0.1,
        "gamma1": 1.0 + 0.1 * jax.random.normal(k3, (out_channels,), jnp.float32),
        "beta1": jnp.zeros((out_channels,), jnp.float32),
        "gamma2": 1.0 + 0.1 * jax.random.normal(k4, (out_channels,), jnp.float32),
        "beta2": jnp.zeros((out_channels,), jnp.float32),
    }


def _reference_forward(x, params):
    """Pure-JAX f32 reference (training-mode BatchNorm2d semantics)."""
    def conv(a, w):
        return jax.lax.conv_general_dilated(
            a, w, window_strides=(1, 1), padding=((1, 1), (1, 1)),
            dimension_numbers=("NCHW", "OIHW", "NCHW"))

    def bn_relu(y, gamma, beta):
        mean = jnp.mean(y, axis=(0, 2, 3), keepdims=True)
        var = jnp.mean((y - mean) ** 2, axis=(0, 2, 3), keepdims=True)
        yhat = (y - mean) * jax.lax.rsqrt(var + BN_EPS)
        return jnp.maximum(yhat * gamma.reshape(1, -1, 1, 1)
                           + beta.reshape(1, -1, 1, 1), 0.0)

    y = bn_relu(conv(x, params["w1"]), params["gamma1"], params["beta1"])
    return bn_relu(conv(y, params["w2"]), params["gamma2"], params["beta2"])


if __name__ == "__main__":
    key = jax.random.PRNGKey(0)
    kx, kp = jax.random.split(key)

    batch, in_channels, out_channels, spatial = 2, 4, 8, 16
    x = jax.random.normal(kx, (batch, in_channels, spatial, spatial), jnp.float32)
    params = init_c2_params(kp, in_channels, out_channels)

    out = c2_forward(x, params)
    jax.block_until_ready(out)

    assert out.shape == (batch, out_channels, spatial, spatial), out.shape
    assert out.dtype == jnp.float32
    assert bool(jnp.all(out >= 0.0))  # ReLU output is non-negative

    # Numerical check vs pure-JAX f32 reference (bf16 MXU inputs / bf16
    # intermediate storage -> loose tolerance, intentional divergence).
    ref = _reference_forward(x, params)
    max_err = float(jnp.max(jnp.abs(out - ref)))
    assert bool(jnp.allclose(out, ref, atol=1e-1, rtol=5e-2)), f"max_err={max_err}"

    print("KERNEL_OK")
</pallas_src>

<mosaic_0001>
module attributes {stable_mosaic.version = 11 : i64} {
  func.func @kernel(%arg0: i32, %arg1: memref<1x4x256xf32, #tpu.memory_space<vmem>>, %arg2: memref<9x8x4xbf16, #tpu.memory_space<vmem>>, %arg3: memref<9x1x256xf32, #tpu.memory_space<vmem>>, %arg4: memref<4x1xf32, #tpu.memory_space<vmem>>, %arg5: memref<4x1xf32, #tpu.memory_space<vmem>>, %arg6: memref<1x8x256xbf16, #tpu.memory_space<vmem>>, %arg7: memref<1x8x2xf32, #tpu.memory_space<vmem>>) attributes {dimension_semantics = [#tpu.dimension_semantics<parallel>], iteration_bounds = array<i64: 2>, scalar_prefetch = 0 : i64, scratch_operands = 0 : i64, tpu.core_type = #tpu.core_type<tc>, window_params = [{transform_indices = @transform_0, window_bounds = array<i64: 1, 4, 256>}, {pipeline_mode = #tpu.pipeline_mode<synchronous>, transform_indices = @transform_1, window_bounds = array<i64: 9, 8, 4>}, {pipeline_mode = #tpu.pipeline_mode<synchronous>, transform_indices = @transform_2, window_bounds = array<i64: 9, 1, 256>}, {pipeline_mode = #tpu.pipeline_mode<synchronous>, transform_indices = @transform_3, window_bounds = array<i64: 4, 1>}, {pipeline_mode = #tpu.pipeline_mode<synchronous>, transform_indices = @transform_4, window_bounds = array<i64: 4, 1>}, {transform_indices = @transform_5, window_bounds = array<i64: 1, 8, 256>}, {transform_indices = @transform_6, window_bounds = array<i64: 1, 8, 2>}]} {
    %c0 = arith.constant 0 : index
    %c0_0 = arith.constant 0 : index
    %c0_1 = arith.constant 0 : index
    %0 = vector.load %arg1[%c0, %c0_0, %c0_1] : memref<1x4x256xf32, #tpu.memory_space<vmem>>, vector<1x4x256xf32>
    %1 = vector.shape_cast %0 : vector<1x4x256xf32> to vector<4x256xf32>
    %cst = arith.constant 0.000000e+00 : f32
    %2 = vector.broadcast %cst : f32 to vector<8x256xf32>
    %3 = vector.extract_strided_slice %1 {offsets = [0, 239], sizes = [4, 17], strides = [1, 1]} : vector<4x256xf32> to vector<4x17xf32>
    %4 = vector.extract_strided_slice %1 {offsets = [0, 0], sizes = [4, 239], strides = [1, 1]} : vector<4x256xf32> to vector<4x239xf32>
    %5 = tpu.concatenate %3, %4 in 1 : vector<4x17xf32>, vector<4x239xf32> -> vector<4x256xf32>
    %c0_2 = arith.constant 0 : index
    %c0_3 = arith.constant 0 : index
    %c0_4 = arith.constant 0 : index
    %6 = vector.load %arg3[%c0_2, %c0_3, %c0_4] : memref<9x1x256xf32, #tpu.memory_space<vmem>>, vector<1x1x256xf32>
    %7 = vector.shape_cast %6 : vector<1x1x256xf32> to vector<1x256xf32>
    %8 = vector.broadcast %7 : vector<1x256xf32> to vector<4x256xf32>
    %9 = arith.mulf %5, %8 : vector<4x256xf32>
    %10 = arith.truncf %9 : vector<4x256xf32> to vector<4x256xbf16>
    %c0_5 = arith.constant 0 : index
    %c0_6 = arith.constant 0 : index
    %c0_7 = arith.constant 0 : index
    %11 = vector.load %arg2[%c0_5, %c0_6, %c0_7] : memref<9x8x4xbf16, #tpu.memory_space<vmem>>, vector<1x8x4xbf16>
    %12 = vector.shape_cast %11 : vector<1x8x4xbf16> to vector<8x4xbf16>
    %cst_8 = arith.constant dense<0.000000e+00> : vector<8x256xf32>
    %13 = tpu.matmul %12, %10, %cst_8 {dimension_numbers = #tpu.dot_dimension_numbers<[1], [0], [0], [1], [0, 0, 1, 1], [], []>} : vector<8x4xbf16>, vector<4x256xbf16>, vector<8x256xf32> -> vector<8x256xf32>
    %14 = arith.addf %2, %13 : vector<8x256xf32>
    %15 = vector.extract_strided_slice %1 {offsets = [0, 240], sizes = [4, 16], strides = [1, 1]} : vector<4x256xf32> to vector<4x16xf32>
    %16 = vector.extract_strided_slice %1 {offsets = [0, 0], sizes = [4, 240], strides = [1, 1]} : vector<4x256xf32> to vector<4x240xf32>
    %17 = tpu.concatenate %15, %16 in 1 : vector<4x16xf32>, vector<4x240xf32> -> vector<4x256xf32>
    %c1 = arith.constant 1 : index
    %c0_9 = arith.constant 0 : index
    %c0_10 = arith.constant 0 : index
    %18 = vector.load %arg3[%c1, %c0_9, %c0_10] : memref<9x1x256xf32, #tpu.memory_space<vmem>>, vector<1x1x256xf32>
    %19 = vector.shape_cast %18 : vector<1x1x256xf32> to vector<1x256xf32>
    %20 = vector.broadcast %19 : vector<1x256xf32> to vector<4x256xf32>
    %21 = arith.mulf %17, %20 : vector<4x256xf32>
    %22 = arith.truncf %21 : vector<4x256xf32> to vector<4x256xbf16>
    %c1_11 = arith.constant 1 : index
    %c0_12 = arith.constant 0 : index
    %c0_13 = arith.constant 0 : index
    %23 = vector.load %arg2[%c1_11, %c0_12, %c0_13] : memref<9x8x4xbf16, #tpu.memory_space<vmem>>, vector<1x8x4xbf16>
    %24 = vector.shape_cast %23 : vector<1x8x4xbf16> to vector<8x4xbf16>
    %cst_14 = arith.constant dense<0.000000e+00> : vector<8x256xf32>
    %25 = tpu.matmul %24, %22, %cst_14 {dimension_numbers = #tpu.dot_dimension_numbers<[1], [0], [0], [1], [0, 0, 1, 1], [], []>} : vector<8x4xbf16>, vector<4x256xbf16>, vector<8x256xf32> -> vector<8x256xf32>
    %26 = arith.addf %14, %25 : vector<8x256xf32>
    %27 = vector.extract_strided_slice %1 {offsets = [0, 241], sizes = [4, 15], strides = [1, 1]} : vector<4x256xf32> to vector<4x15xf32>
    %28 = vector.extract_strided_slice %1 {offsets = [0, 0], sizes = [4, 241], strides = [1, 1]} : vector<4x256xf32> to vector<4x241xf32>
    %29 = tpu.concatenate %27, %28 in 1 : vector<4x15xf32>, vector<4x241xf32> -> vector<4x256xf32>
    %c2 = arith.constant 2 : index
    %c0_15 = arith.constant 0 : index
    %c0_16 = arith.constant 0 : index
    %30 = vector.load %arg3[%c2, %c0_15, %c0_16] : memref<9x1x256xf32, #tpu.memory_space<vmem>>, vector<1x1x256xf32>
    %31 = vector.shape_cast %30 : vector<1x1x256xf32> to vector<1x256xf32>
    %32 = vector.broadcast %31 : vector<1x256xf32> to vector<4x256xf32>
    %33 = arith.mulf %29, %32 : vector<4x256xf32>
    %34 = arith.truncf %33 : vector<4x256xf32> to vector<4x256xbf16>
    %c2_17 = arith.constant 2 : index
    %c0_18 = arith.constant 0 : index
    %c0_19 = arith.constant 0 : index
    %35 = vector.load %arg2[%c2_17, %c0_18, %c0_19] : memref<9x8x4xbf16, #tpu.memory_space<vmem>>, vector<1x8x4xbf16>
    %36 = vector.shape_cast %35 : vector<1x8x4xbf16> to vector<8x4xbf16>
    %cst_20 = arith.constant dense<0.000000e+00> : vector<8x256xf32>
    %37 = tpu.matmul %36, %34, %cst_20 {dimension_numbers = #tpu.dot_dimension_numbers<[1], [0], [0], [1], [0, 0, 1, 1], [], []>} : vector<8x4xbf16>, vector<4x256xbf16>, vector<8x256xf32> -> vector<8x256xf32>
    %38 = arith.addf %26, %37 : vector<8x256xf32>
    %39 = vector.extract_strided_slice %1 {offsets = [0, 255], sizes = [4, 1], strides = [1, 1]} : vector<4x256xf32> to vector<4x1xf32>
    %40 = vector.extract_strided_slice %1 {offsets = [0, 0], sizes = [4, 255], strides = [1, 1]} : vector<4x256xf32> to vector<4x255xf32>
    %41 = tpu.concatenate %39, %40 in 1 : vector<4x1xf32>, vector<4x255xf32> -> vector<4x256xf32>
    %c3 = arith.constant 3 : index
    %c0_21 = arith.constant 0 : index
    %c0_22 = arith.constant 0 : index
    %42 = vector.load %arg3[%c3, %c0_21, %c0_22] : memref<9x1x256xf32, #tpu.memory_space<vmem>>, vector<1x1x256xf32>
    %43 = vector.shape_cast %42 : vector<1x1x256xf32> to vector<1x256xf32>
    %44 = vector.broadcast %43 : vector<1x256xf32> to vector<4x256xf32>
    %45 = arith.mulf %41, %44 : vector<4x256xf32>
    %46 = arith.truncf %45 : vector<4x256xf32> to vector<4x256xbf16>
    %c3_23 = arith.constant 3 : index
    %c0_24 = arith.constant 0 : index
    %c0_25 = arith.constant 0 : index
    %47 = vector.load %arg2[%c3_23, %c0_24, %c0_25] : memref<9x8x4xbf16, #tpu.memory_space<vmem>>, vector<1x8x4xbf16>
    %48 = vector.shape_cast %47 : vector<1x8x4xbf16> to vector<8x4xbf16>
    %cst_26 = arith.constant dense<0.000000e+00> : vector<8x256xf32>
    %49 = tpu.matmul %48, %46, %cst_26 {dimension_numbers = #tpu.dot_dimension_numbers<[1], [0], [0], [1], [0, 0, 1, 1], [], []>} : vector<8x4xbf16>, vector<4x256xbf16>, vector<8x256xf32> -> vector<8x256xf32>
    %50 = arith.addf %38, %49 : vector<8x256xf32>
    %c4 = arith.constant 4 : index
    %c0_27 = arith.constant 0 : index
    %c0_28 = arith.constant 0 : index
    %51 = vector.load %arg3[%c4, %c0_27, %c0_28] : memref<9x1x256xf32, #tpu.memory_space<vmem>>, vector<1x1x256xf32>
    %52 = vector.shape_cast %51 : vector<1x1x256xf32> to vector<1x256xf32>
    %53 = vector.broadcast %52 : vector<1x256xf32> to vector<4x256xf32>
    %54 = arith.mulf %1, %53 : vector<4x256xf32>
    %55 = arith.truncf %54 : vector<4x256xf32> to vector<4x256xbf16>
    %c4_29 = arith.constant 4 : index
    %c0_30 = arith.constant 0 : index
    %c0_31 = arith.constant 0 : index
    %56 = vector.load %arg2[%c4_29, %c0_30, %c0_31] : memref<9x8x4xbf16, #tpu.memory_space<vmem>>, vector<1x8x4xbf16>
    %57 = vector.shape_cast %56 : vector<1x8x4xbf16> to vector<8x4xbf16>
    %cst_32 = arith.constant dense<0.000000e+00> : vector<8x256xf32>
    %58 = tpu.matmul %57, %55, %cst_32 {dimension_numbers = #tpu.dot_dimension_numbers<[1], [0], [0], [1], [0, 0, 1, 1], [], []>} : vector<8x4xbf16>, vector<4x256xbf16>, vector<8x256xf32> -> vector<8x256xf32>
    %59 = arith.addf %50, %58 : vector<8x256xf32>
    %60 = vector.extract_strided_slice %1 {offsets = [0, 1], sizes = [4, 255], strides = [1, 1]} : vector<4x256xf32> to vector<4x255xf32>
    %61 = vector.extract_strided_slice %1 {offsets = [0, 0], sizes = [4, 1], strides = [1, 1]} : vector<4x256xf32> to vector<4x1xf32>
    %62 = tpu.concatenate %60, %61 in 1 : vector<4x255xf32>, vector<4x1xf32> -> vector<4x256xf32>
    %c5 = arith.constant 5 : index
    %c0_33 = arith.constant 0 : index
    %c0_34 = arith.constant 0 : index
    %63 = vector.load %arg3[%c5, %c0_33, %c0_34] : memref<9x1x256xf32, #tpu.memory_space<vmem>>, vector<1x1x256xf32>
    %64 = vector.shape_cast %63 : vector<1x1x256xf32> to vector<1x256xf32>
    %65 = vector.broadcast %64 : vector<1x256xf32> to vector<4x256xf32>
    %66 = arith.mulf %62, %65 : vector<4x256xf32>
    %67 = arith.truncf %66 : vector<4x256xf32> to vector<4x256xbf16>
    %c5_35 = arith.constant 5 : index
    %c0_36 = arith.constant 0 : index
    %c0_37 = arith.constant 0 : index
    %68 = vector.load %arg2[%c5_35, %c0_36, %c0_37] : memref<9x8x4xbf16, #tpu.memory_space<vmem>>, vector<1x8x4xbf16>
    %69 = vector.shape_cast %68 : vector<1x8x4xbf16> to vector<8x4xbf16>
    %cst_38 = arith.constant dense<0.000000e+00> : vector<8x256xf32>
    %70 = tpu.matmul %69, %67, %cst_38 {dimension_numbers = #tpu.dot_dimension_numbers<[1], [0], [0], [1], [0, 0, 1, 1], [], []>} : vector<8x4xbf16>, vector<4x256xbf16>, vector<8x256xf32> -> vector<8x256xf32>
    %71 = arith.addf %59, %70 : vector<8x256xf32>
    %72 = vector.extract_strided_slice %1 {offsets = [0, 15], sizes = [4, 241], strides = [1, 1]} : vector<4x256xf32> to vector<4x241xf32>
    %73 = vector.extract_strided_slice %1 {offsets = [0, 0], sizes = [4, 15], strides = [1, 1]} : vector<4x256xf32> to vector<4x15xf32>
    %74 = tpu.concatenate %72, %73 in 1 : vector<4x241xf32>, vector<4x15xf32> -> vector<4x256xf32>
    %c6 = arith.constant 6 : index
    %c0_39 = arith.constant 0 : index
    %c0_40 = arith.constant 0 : index
    %75 = vector.load %arg3[%c6, %c0_39, %c0_40] : memref<9x1x256xf32, #tpu.memory_space<vmem>>, vector<1x1x256xf32>
    %76 = vector.shape_cast %75 : vector<1x1x256xf32> to vector<1x256xf32>
    %77 = vector.broadcast %76 : vector<1x256xf32> to vector<4x256xf32>
    %78 = arith.mulf %74, %77 : vector<4x256xf32>
    %79 = arith.truncf %78 : vector<4x256xf32> to vector<4x256xbf16>
    %c6_41 = arith.constant 6 : index
    %c0_42 = arith.constant 0 : index
    %c0_43 = arith.constant 0 : index
    %80 = vector.load %arg2[%c6_41, %c0_42, %c0_43] : memref<9x8x4xbf16, #tpu.memory_space<vmem>>, vector<1x8x4xbf16>
    %81 = vector.shape_cast %80 : vector<1x8x4xbf16> to vector<8x4xbf16>
    %cst_44 = arith.constant dense<0.000000e+00> : vector<8x256xf32>
    %82 = tpu.matmul %81, %79, %cst_44 {dimension_numbers = #tpu.dot_dimension_numbers<[1], [0], [0], [1], [0, 0, 1, 1], [], []>} : vector<8x4xbf16>, vector<4x256xbf16>, vector<8x256xf32> -> vector<8x256xf32>
    %83 = arith.addf %71, %82 : vector<8x256xf32>
    %84 = vector.extract_strided_slice %1 {offsets = [0, 16], sizes = [4, 240], strides = [1, 1]} : vector<4x256xf32> to vector<4x240xf32>
    %85 = vector.extract_strided_slice %1 {offsets = [0, 0], sizes = [4, 16], strides = [1, 1]} : vector<4x256xf32> to vector<4x16xf32>
    %86 = tpu.concatenate %84, %85 in 1 : vector<4x240xf32>, vector<4x16xf32> -> vector<4x256xf32>
    %c7 = arith.constant 7 : index
    %c0_45 = arith.constant 0 : index
    %c0_46 = arith.constant 0 : index
    %87 = vector.load %arg3[%c7, %c0_45, %c0_46] : memref<9x1x256xf32, #tpu.memory_space<vmem>>, vector<1x1x256xf32>
    %88 = vector.shape_cast %87 : vector<1x1x256xf32> to vector<1x256xf32>
    %89 = vector.broadcast %88 : vector<1x256xf32> to vector<4x256xf32>
    %90 = arith.mulf %86, %89 : vector<4x256xf32>
    %91 = arith.truncf %90 : vector<4x256xf32> to vector<4x256xbf16>
    %c7_47 = arith.constant 7 : index
    %c0_48 = arith.constant 0 : index
    %c0_49 = arith.constant 0 : index
    %92 = vector.load %arg2[%c7_47, %c0_48, %c0_49] : memref<9x8x4xbf16, #tpu.memory_space<vmem>>, vector<1x8x4xbf16>
    %93 = vector.shape_cast %92 : vector<1x8x4xbf16> to vector<8x4xbf16>
    %cst_50 = arith.constant dense<0.000000e+00> : vector<8x256xf32>
    %94 = tpu.matmul %93, %91, %cst_50 {dimension_numbers = #tpu.dot_dimension_numbers<[1], [0], [0], [1], [0, 0, 1, 1], [], []>} : vector<8x4xbf16>, vector<4x256xbf16>, vector<8x256xf32> -> vector<8x256xf32>
    %95 = arith.addf %83, %94 : vector<8x256xf32>
    %96 = vector.extract_strided_slice %1 {offsets = [0, 17], sizes = [4, 239], strides = [1, 1]} : vector<4x256xf32> to vector<4x239xf32>
    %97 = vector.extract_strided_slice %1 {offsets = [0, 0], sizes = [4, 17], strides = [1, 1]} : vector<4x256xf32> to vector<4x17xf32>
    %98 = tpu.concatenate %96, %97 in 1 : vector<4x239xf32>, vector<4x17xf32> -> vector<4x256xf32>
    %c8 = arith.constant 8 : index
    %c0_51 = arith.constant 0 : index
    %c0_52 = arith.constant 0 : index
    %99 = vector.load %arg3[%c8, %c0_51, %c0_52] : memref<9x1x256xf32, #tpu.memory_space<vmem>>, vector<1x1x256xf32>
    %100 = vector.shape_cast %99 : vector<1x1x256xf32> to vector<1x256xf32>
    %101 = vector.broadcast %100 : vector<1x256xf32> to vector<4x256xf32>
    %102 = arith.mulf %98, %101 : vector<4x256xf32>
    %103 = arith.truncf %102 : vector<4x256xf32> to vector<4x256xbf16>
    %c8_53 = arith.constant 8 : index
    %c0_54 = arith.constant 0 : index
    %c0_55 = arith.constant 0 : index
    %104 = vector.load %arg2[%c8_53, %c0_54, %c0_55] : memref<9x8x4xbf16, #tpu.memory_space<vmem>>, vector<1x8x4xbf16>
    %105 = vector.shape_cast %104 : vector<1x8x4xbf16> to vector<8x4xbf16>
    %cst_56 = arith.constant dense<0.000000e+00> : vector<8x256xf32>
    %106 = tpu.matmul %105, %103, %cst_56 {dimension_numbers = #tpu.dot_dimension_numbers<[1], [0], [0], [1], [0, 0, 1, 1], [], []>} : vector<8x4xbf16>, vector<4x256xbf16>, vector<8x256xf32> -> vector<8x256xf32>
    %107 = arith.addf %95, %106 : vector<8x256xf32>
    %108 = vector.shape_cast %107 : vector<8x256xf32> to vector<1x8x256xf32>
    %109 = arith.truncf %108 : vector<1x8x256xf32> to vector<1x8x256xbf16>
    %c0_57 = arith.constant 0 : index
    %c0_58 = arith.constant 0 : index
    %c0_59 = arith.constant 0 : index
    %110 = vector.load %arg6[%c0_57, %c0_58, %c0_59] : memref<1x8x256xbf16, #tpu.memory_space<vmem>>, vector<1x8x256xbf16>
    tpu.vector_store %arg6[%c0_57, %c0_58, %c0_59], %109 {strides = array<i32>} : memref<1x8x256xbf16, #tpu.memory_space<vmem>>, vector<1x8x256xbf16>,
    %cst_60 = arith.constant dense<0.000000e+00> : vector<8xf32>
    %111 = vector.multi_reduction <add>, %107, %cst_60 [1] : vector<8x256xf32> to vector<8xf32>
    %112 = vector.shape_cast %111 : vector<8xf32> to vector<8x1xf32>
    %113 = arith.mulf %107, %107 : vector<8x256xf32>
    %cst_61 = arith.constant dense<0.000000e+00> : vector<8xf32>
    %114 = vector.multi_reduction <add>, %113, %cst_61 [1] : vector<8x256xf32> to vector<8xf32>
    %115 = vector.shape_cast %114 : vector<8xf32> to vector<8x1xf32>
    %116 = tpu.concatenate %112, %115 in 1 : vector<8x1xf32>, vector<8x1xf32> -> vector<8x2xf32>
    %117 = vector.shape_cast %116 : vector<8x2xf32> to vector<1x8x2xf32>
    %c0_62 = arith.constant 0 : index
    %c0_63 = arith.constant 0 : index
    %c0_64 = arith.constant 0 : index
    %118 = vector.load %arg7[%c0_62, %c0_63, %c0_64] : memref<1x8x2xf32, #tpu.memory_space<vmem>>, vector<1x8x2xf32>
    tpu.vector_store %arg7[%c0_62, %c0_63, %c0_64], %117 {strides = array<i32>} : memref<1x8x2xf32, #tpu.memory_space<vmem>>, vector<1x8x2xf32>,
    return
  }
  func.func @transform_0(%arg0: i32) -> (i32, i32, i32) {
    %c0_i32 = arith.constant 0 : i32
    %c0_i32_0 = arith.constant 0 : i32
    %c0_i32_1 = arith.constant 0 : i32
    return %arg0, %c0_i32, %c0_i32_0 : i32, i32, i32
  }
  func.func @transform_1(%arg0: i32) -> (i32, i32, i32) {
    %c0_i32 = arith.constant 0 : i32
    %c0_i32_0 = arith.constant 0 : i32
    %c0_i32_1 = arith.constant 0 : i32
    %c0_i32_2 = arith.constant 0 : i32
    return %c0_i32, %c0_i32_0, %c0_i32_1 : i32, i32, i32
  }
  func.func @transform_2(%arg0: i32) -> (i32, i32, i32) {
    %c0_i32 = arith.constant 0 : i32
    %c0_i32_0 = arith.constant 0 : i32
    %c0_i32_1 = arith.constant 0 : i32
    %c0_i32_2 = arith.constant 0 : i32
    return %c0_i32, %c0_i32_0, %c0_i32_1 : i32, i32, i32
  }
  func.func @transform_3(%arg0: i32) -> (i32, i32) {
    %c0_i32 = arith.constant 0 : i32
    %c0_i32_0 = arith.constant 0 : i32
    %c0_i32_1 = arith.constant 0 : i32
    return %c0_i32, %c0_i32_0 : i32, i32
  }
  func.func @transform_4(%arg0: i32) -> (i32, i32) {
    %c0_i32 = arith.constant 0 : i32
    %c0_i32_0 = arith.constant 0 : i32
    %c0_i32_1 = arith.constant 0 : i32
    return %c0_i32, %c0_i32_0 : i32, i32
  }
  func.func @transform_5(%arg0: i32) -> (i32, i32, i32) {
    %c0_i32 = arith.constant 0 : i32
    %c0_i32_0 = arith.constant 0 : i32
    %c0_i32_1 = arith.constant 0 : i32
    return %arg0, %c0_i32, %c0_i32_0 : i32, i32, i32
  }
  func.func @transform_6(%arg0: i32) -> (i32, i32, i32) {
    %c0_i32 = arith.constant 0 : i32
    %c0_i32_0 = arith.constant 0 : i32
    %c0_i32_1 = arith.constant 0 : i32
    return %arg0, %c0_i32, %c0_i32_0 : i32, i32, i32
  }
}

module attributes {stable_mosaic.version = 11 : i64} {
  func.func @kernel(%arg0: i32, %arg1: memref<1x8x256xbf16, #tpu.memory_space<vmem>>, %arg2: memref<9x8x8xbf16, #tpu.memory_space<vmem>>, %arg3: memref<9x1x256xf32, #tpu.memory_space<vmem>>, %arg4: memref<8x1xf32, #tpu.memory_space<vmem>>, %arg5: memref<8x1xf32, #tpu.memory_space<vmem>>, %arg6: memref<1x8x256xf32, #tpu.memory_space<vmem>>, %arg7: memref<1x8x2xf32, #tpu.memory_space<vmem>>) attributes {dimension_semantics = [#tpu.dimension_semantics<parallel>], iteration_bounds = array<i64: 2>, scalar_prefetch = 0 : i64, scratch_operands = 0 : i64, tpu.core_type = #tpu.core_type<tc>, window_params = [{transform_indices = @transform_0, window_bounds = array<i64: 1, 8, 256>}, {pipeline_mode = #tpu.pipeline_mode<synchronous>, transform_indices = @transform_1, window_bounds = array<i64: 9, 8, 8>}, {pipeline_mode = #tpu.pipeline_mode<synchronous>, transform_indices = @transform_2, window_bounds = array<i64: 9, 1, 256>}, {pipeline_mode = #tpu.pipeline_mode<synchronous>, transform_indices = @transform_3, window_bounds = array<i64: 8, 1>}, {pipeline_mode = #tpu.pipeline_mode<synchronous>, transform_indices = @transform_4, window_bounds = array<i64: 8, 1>}, {transform_indices = @transform_5, window_bounds = array<i64: 1, 8, 256>}, {transform_indices = @transform_6, window_bounds = array<i64: 1, 8, 2>}]} {
    %c0 = arith.constant 0 : index
    %c0_0 = arith.constant 0 : index
    %c0_1 = arith.constant 0 : index
    %0 = vector.load %arg1[%c0, %c0_0, %c0_1] : memref<1x8x256xbf16, #tpu.memory_space<vmem>>, vector<1x8x256xbf16>
    %1 = vector.shape_cast %0 : vector<1x8x256xbf16> to vector<8x256xbf16>
    %2 = arith.extf %1 : vector<8x256xbf16> to vector<8x256xf32>
    %c0_2 = arith.constant 0 : index
    %c0_3 = arith.constant 0 : index
    %3 = vector.load %arg4[%c0_2, %c0_3] : memref<8x1xf32, #tpu.memory_space<vmem>>, vector<8x1xf32>
    %4 = vector.broadcast %3 : vector<8x1xf32> to vector<8x256xf32>
    %5 = arith.mulf %2, %4 : vector<8x256xf32>
    %c0_4 = arith.constant 0 : index
    %c0_5 = arith.constant 0 : index
    %6 = vector.load %arg5[%c0_4, %c0_5] : memref<8x1xf32, #tpu.memory_space<vmem>>, vector<8x1xf32>
    %7 = vector.broadcast %6 : vector<8x1xf32> to vector<8x256xf32>
    %8 = arith.addf %5, %7 : vector<8x256xf32>
    %cst = arith.constant 0.000000e+00 : f32
    %9 = vector.broadcast %cst : f32 to vector<8x256xf32>
    %10 = arith.maximumf %8, %9 : vector<8x256xf32>
    %cst_6 = arith.constant 0.000000e+00 : f32
    %11 = vector.broadcast %cst_6 : f32 to vector<8x256xf32>
    %12 = vector.extract_strided_slice %10 {offsets = [0, 239], sizes = [8, 17], strides = [1, 1]} : vector<8x256xf32> to vector<8x17xf32>
    %13 = vector.extract_strided_slice %10 {offsets = [0, 0], sizes = [8, 239], strides = [1, 1]} : vector<8x256xf32> to vector<8x239xf32>
    %14 = tpu.concatenate %12, %13 in 1 : vector<8x17xf32>, vector<8x239xf32> -> vector<8x256xf32>
    %c0_7 = arith.constant 0 : index
    %c0_8 = arith.constant 0 : index
    %c0_9 = arith.constant 0 : index
    %15 = vector.load %arg3[%c0_7, %c0_8, %c0_9] : memref<9x1x256xf32, #tpu.memory_space<vmem>>, vector<1x1x256xf32>
    %16 = vector.shape_cast %15 : vector<1x1x256xf32> to vector<1x256xf32>
    %17 = vector.broadcast %16 : vector<1x256xf32> to vector<8x256xf32>
    %18 = arith.mulf %14, %17 : vector<8x256xf32>
    %19 = arith.truncf %18 : vector<8x256xf32> to vector<8x256xbf16>
    %c0_10 = arith.constant 0 : index
    %c0_11 = arith.constant 0 : index
    %c0_12 = arith.constant 0 : index
    %20 = vector.load %arg2[%c0_10, %c0_11, %c0_12] : memref<9x8x8xbf16, #tpu.memory_space<vmem>>, vector<1x8x8xbf16>
    %21 = vector.shape_cast %20 : vector<1x8x8xbf16> to vector<8x8xbf16>
    %cst_13 = arith.constant dense<0.000000e+00> : vector<8x256xf32>
    %22 = tpu.matmul %21, %19, %cst_13 {dimension_numbers = #tpu.dot_dimension_numbers<[1], [0], [0], [1], [0, 0, 1, 1], [], []>} : vector<8x8xbf16>, vector<8x256xbf16>, vector<8x256xf32> -> vector<8x256xf32>
    %23 = arith.addf %11, %22 : vector<8x256xf32>
    %24 = vector.extract_strided_slice %10 {offsets = [0, 240], sizes = [8, 16], strides = [1, 1]} : vector<8x256xf32> to vector<8x16xf32>
    %25 = vector.extract_strided_slice %10 {offsets = [0, 0], sizes = [8, 240], strides = [1, 1]} : vector<8x256xf32> to vector<8x240xf32>
    %26 = tpu.concatenate %24, %25 in 1 : vector<8x16xf32>, vector<8x240xf32> -> vector<8x256xf32>
    %c1 = arith.constant 1 : index
    %c0_14 = arith.constant 0 : index
    %c0_15 = arith.constant 0 : index
    %27 = vector.load %arg3[%c1, %c0_14, %c0_15] : memref<9x1x256xf32, #tpu.memory_space<vmem>>, vector<1x1x256xf32>
    %28 = vector.shape_cast %27 : vector<1x1x256xf32> to vector<1x256xf32>
    %29 = vector.broadcast %28 : vector<1x256xf32> to vector<8x256xf32>
    %30 = arith.mulf %26, %29 : vector<8x256xf32>
    %31 = arith.truncf %30 : vector<8x256xf32> to vector<8x256xbf16>
    %c1_16 = arith.constant 1 : index
    %c0_17 = arith.constant 0 : index
    %c0_18 = arith.constant 0 : index
    %32 = vector.load %arg2[%c1_16, %c0_17, %c0_18] : memref<9x8x8xbf16, #tpu.memory_space<vmem>>, vector<1x8x8xbf16>
    %33 = vector.shape_cast %32 : vector<1x8x8xbf16> to vector<8x8xbf16>
    %cst_19 = arith.constant dense<0.000000e+00> : vector<8x256xf32>
    %34 = tpu.matmul %33, %31, %cst_19 {dimension_numbers = #tpu.dot_dimension_numbers<[1], [0], [0], [1], [0, 0, 1, 1], [], []>} : vector<8x8xbf16>, vector<8x256xbf16>, vector<8x256xf32> -> vector<8x256xf32>
    %35 = arith.addf %23, %34 : vector<8x256xf32>
    %36 = vector.extract_strided_slice %10 {offsets = [0, 241], sizes = [8, 15], strides = [1, 1]} : vector<8x256xf32> to vector<8x15xf32>
    %37 = vector.extract_strided_slice %10 {offsets = [0, 0], sizes = [8, 241], strides = [1, 1]} : vector<8x256xf32> to vector<8x241xf32>
    %38 = tpu.concatenate %36, %37 in 1 : vector<8x15xf32>, vector<8x241xf32> -> vector<8x256xf32>
    %c2 = arith.constant 2 : index
    %c0_20 = arith.constant 0 : index
    %c0_21 = arith.constant 0 : index
    %39 = vector.load %arg3[%c2, %c0_20, %c0_21] : memref<9x1x256xf32, #tpu.memory_space<vmem>>, vector<1x1x256xf32>
    %40 = vector.shape_cast %39 : vector<1x1x256xf32> to vector<1x256xf32>
    %41 = vector.broadcast %40 : vector<1x256xf32> to vector<8x256xf32>
    %42 = arith.mulf %38, %41 : vector<8x256xf32>
    %43 = arith.truncf %42 : vector<8x256xf32> to vector<8x256xbf16>
    %c2_22 = arith.constant 2 : index
    %c0_23 = arith.constant 0 : index
    %c0_24 = arith.constant 0 : index
    %44 = vector.load %arg2[%c2_22, %c0_23, %c0_24] : memref<9x8x8xbf16, #tpu.memory_space<vmem>>, vector<1x8x8xbf16>
    %45 = vector.shape_cast %44 : vector<1x8x8xbf16> to vector<8x8xbf16>
    %cst_25 = arith.constant dense<0.000000e+00> : vector<8x256xf32>
    %46 = tpu.matmul %45, %43, %cst_25 {dimension_numbers = #tpu.dot_dimension_numbers<[1], [0], [0], [1], [0, 0, 1, 1], [], []>} : vector<8x8xbf16>, vector<8x256xbf16>, vector<8x256xf32> -> vector<8x256xf32>
    %47 = arith.addf %35, %46 : vector<8x256xf32>
    %48 = vector.extract_strided_slice %10 {offsets = [0, 255], sizes = [8, 1], strides = [1, 1]} : vector<8x256xf32> to vector<8x1xf32>
    %49 = vector.extract_strided_slice %10 {offsets = [0, 0], sizes = [8, 255], strides = [1, 1]} : vector<8x256xf32> to vector<8x255xf32>
    %50 = tpu.concatenate %48, %49 in 1 : vector<8x1xf32>, vector<8x255xf32> -> vector<8x256xf32>
    %c3 = arith.constant 3 : index
    %c0_26 = arith.constant 0 : index
    %c0_27 = arith.constant 0 : index
    %51 = vector.load %arg3[%c3, %c0_26, %c0_27] : memref<9x1x256xf32, #tpu.memory_space<vmem>>, vector<1x1x256xf32>
    %52 = vector.shape_cast %51 : vector<1x1x256xf32> to vector<1x256xf32>
    %53 = vector.broadcast %52 : vector<1x256xf32> to vector<8x256xf32>
    %54 = arith.mulf %50, %53 : vector<8x256xf32>
    %55 = arith.truncf %54 : vector<8x256xf32> to vector<8x256xbf16>
    %c3_28 = arith.constant 3 : index
    %c0_29 = arith.constant 0 : index
    %c0_30 = arith.constant 0 : index
    %56 = vector.load %arg2[%c3_28, %c0_29, %c0_30] : memref<9x8x8xbf16, #tpu.memory_space<vmem>>, vector<1x8x8xbf16>
    %57 = vector.shape_cast %56 : vector<1x8x8xbf16> to vector<8x8xbf16>
    %cst_31 = arith.constant dense<0.000000e+00> : vector<8x256xf32>
    %58 = tpu.matmul %57, %55, %cst_31 {dimension_numbers = #tpu.dot_dimension_numbers<[1], [0], [0], [1], [0, 0, 1, 1], [], []>} : vector<8x8xbf16>, vector<8x256xbf16>, vector<8x256xf32> -> vector<8x256xf32>
    %59 = arith.addf %47, %58 : vector<8x256xf32>
    %c4 = arith.constant 4 : index
    %c0_32 = arith.constant 0 : index
    %c0_33 = arith.constant 0 : index
    %60 = vector.load %arg3[%c4, %c0_32, %c0_33] : memref<9x1x256xf32, #tpu.memory_space<vmem>>, vector<1x1x256xf32>
    %61 = vector.shape_cast %60 : vector<1x1x256xf32> to vector<1x256xf32>
    %62 = vector.broadcast %61 : vector<1x256xf32> to vector<8x256xf32>
    %63 = arith.mulf %10, %62 : vector<8x256xf32>
    %64 = arith.truncf %63 : vector<8x256xf32> to vector<8x256xbf16>
    %c4_34 = arith.constant 4 : index
    %c0_35 = arith.constant 0 : index
    %c0_36 = arith.constant 0 : index
    %65 = vector.load %arg2[%c4_34, %c0_35, %c0_36] : memref<9x8x8xbf16, #tpu.memory_space<vmem>>, vector<1x8x8xbf16>
    %66 = vector.shape_cast %65 : vector<1x8x8xbf16> to vector<8x8xbf16>
    %cst_37 = arith.constant dense<0.000000e+00> : vector<8x256xf32>
    %67 = tpu.matmul %66, %64, %cst_37 {dimension_numbers = #tpu.dot_dimension_numbers<[1], [0], [0], [1], [0, 0, 1, 1], [], []>} : vector<8x8xbf16>, vector<8x256xbf16>, vector<8x256xf32> -> vector<8x256xf32>
    %68 = arith.addf %59, %67 : vector<8x256xf32>
    %69 = vector.extract_strided_slice %10 {offsets = [0, 1], sizes = [8, 255], strides = [1, 1]} : vector<8x256xf32> to vector<8x255xf32>
    %70 = vector.extract_strided_slice %10 {offsets = [0, 0], sizes = [8, 1], strides = [1, 1]} : vector<8x256xf32> to vector<8x1xf32>
    %71 = tpu.concatenate %69, %70 in 1 : vector<8x255xf32>, vector<8x1xf32> -> vector<8x256xf32>
    %c5 = arith.constant 5 : index
    %c0_38 = arith.constant 0 : index
    %c0_39 = arith.constant 0 : index
    %72 = vector.load %arg3[%c5, %c0_38, %c0_39] : memref<9x1x256xf32, #tpu.memory_space<vmem>>, vector<1x1x256xf32>
    %73 = vector.shape_cast %72 : vector<1x1x256xf32> to vector<1x256xf32>
    %74 = vector.broadcast %73 : vector<1x256xf32> to vector<8x256xf32>
    %75 = arith.mulf %71, %74 : vector<8x256xf32>
    %76 = arith.truncf %75 : vector<8x256xf32> to vector<8x256xbf16>
    %c5_40 = arith.constant 5 : index
    %c0_41 = arith.constant 0 : index
    %c0_42 = arith.constant 0 : index
    %77 = vector.load %arg2[%c5_40, %c0_41, %c0_42] : memref<9x8x8xbf16, #tpu.memory_space<vmem>>, vector<1x8x8xbf16>
    %78 = vector.shape_cast %77 : vector<1x8x8xbf16> to vector<8x8xbf16>
    %cst_43 = arith.constant dense<0.000000e+00> : vector<8x256xf32>
    %79 = tpu.matmul %78, %76, %cst_43 {dimension_numbers = #tpu.dot_dimension_numbers<[1], [0], [0], [1], [0, 0, 1, 1], [], []>} : vector<8x8xbf16>, vector<8x256xbf16>, vector<8x256xf32> -> vector<8x256xf32>
    %80 = arith.addf %68, %79 : vector<8x256xf32>
    %81 = vector.extract_strided_slice %10 {offsets = [0, 15], sizes = [8, 241], strides = [1, 1]} : vector<8x256xf32> to vector<8x241xf32>
    %82 = vector.extract_strided_slice %10 {offsets = [0, 0], sizes = [8, 15], strides = [1, 1]} : vector<8x256xf32> to vector<8x15xf32>
    %83 = tpu.concatenate %81, %82 in 1 : vector<8x241xf32>, vector<8x15xf32> -> vector<8x256xf32>
    %c6 = arith.constant 6 : index
    %c0_44 = arith.constant 0 : index
    %c0_45 = arith.constant 0 : index
    %84 = vector.load %arg3[%c6, %c0_44, %c0_45] : memref<9x1x256xf32, #tpu.memory_space<vmem>>, vector<1x1x256xf32>
    %85 = vector.shape_cast %84 : vector<1x1x256xf32> to vector<1x256xf32>
    %86 = vector.broadcast %85 : vector<1x256xf32> to vector<8x256xf32>
    %87 = arith.mulf %83, %86 : vector<8x256xf32>
    %88 = arith.truncf %87 : vector<8x256xf32> to vector<8x256xbf16>
    %c6_46 = arith.constant 6 : index
    %c0_47 = arith.constant 0 : index
    %c0_48 = arith.constant 0 : index
    %89 = vector.load %arg2[%c6_46, %c0_47, %c0_48] : memref<9x8x8xbf16, #tpu.memory_space<vmem>>, vector<1x8x8xbf16>
    %90 = vector.shape_cast %89 : vector<1x8x8xbf16> to vector<8x8xbf16>
    %cst_49 = arith.constant dense<0.000000e+00> : vector<8x256xf32>
    %91 = tpu.matmul %90, %88, %cst_49 {dimension_numbers = #tpu.dot_dimension_numbers<[1], [0], [0], [1], [0, 0, 1, 1], [], []>} : vector<8x8xbf16>, vector<8x256xbf16>, vector<8x256xf32> -> vector<8x256xf32>
    %92 = arith.addf %80, %91 : vector<8x256xf32>
    %93 = vector.extract_strided_slice %10 {offsets = [0, 16], sizes = [8, 240], strides = [1, 1]} : vector<8x256xf32> to vector<8x240xf32>
    %94 = vector.extract_strided_slice %10 {offsets = [0, 0], sizes = [8, 16], strides = [1, 1]} : vector<8x256xf32> to vector<8x16xf32>
    %95 = tpu.concatenate %93, %94 in 1 : vector<8x240xf32>, vector<8x16xf32> -> vector<8x256xf32>
    %c7 = arith.constant 7 : index
    %c0_50 = arith.constant 0 : index
    %c0_51 = arith.constant 0 : index
    %96 = vector.load %arg3[%c7, %c0_50, %c0_51] : memref<9x1x256xf32, #tpu.memory_space<vmem>>, vector<1x1x256xf32>
    %97 = vector.shape_cast %96 : vector<1x1x256xf32> to vector<1x256xf32>
    %98 = vector.broadcast %97 : vector<1x256xf32> to vector<8x256xf32>
    %99 = arith.mulf %95, %98 : vector<8x256xf32>
    %100 = arith.truncf %99 : vector<8x256xf32> to vector<8x256xbf16>
    %c7_52 = arith.constant 7 : index
    %c0_53 = arith.constant 0 : index
    %c0_54 = arith.constant 0 : index
    %101 = vector.load %arg2[%c7_52, %c0_53, %c0_54] : memref<9x8x8xbf16, #tpu.memory_space<vmem>>, vector<1x8x8xbf16>
    %102 = vector.shape_cast %101 : vector<1x8x8xbf16> to vector<8x8xbf16>
    %cst_55 = arith.constant dense<0.000000e+00> : vector<8x256xf32>
    %103 = tpu.matmul %102, %100, %cst_55 {dimension_numbers = #tpu.dot_dimension_numbers<[1], [0], [0], [1], [0, 0, 1, 1], [], []>} : vector<8x8xbf16>, vector<8x256xbf16>, vector<8x256xf32> -> vector<8x256xf32>
    %104 = arith.addf %92, %103 : vector<8x256xf32>
    %105 = vector.extract_strided_slice %10 {offsets = [0, 17], sizes = [8, 239], strides = [1, 1]} : vector<8x256xf32> to vector<8x239xf32>
    %106 = vector.extract_strided_slice %10 {offsets = [0, 0], sizes = [8, 17], strides = [1, 1]} : vector<8x256xf32> to vector<8x17xf32>
    %107 = tpu.concatenate %105, %106 in 1 : vector<8x239xf32>, vector<8x17xf32> -> vector<8x256xf32>
    %c8 = arith.constant 8 : index
    %c0_56 = arith.constant 0 : index
    %c0_57 = arith.constant 0 : index
    %108 = vector.load %arg3[%c8, %c0_56, %c0_57] : memref<9x1x256xf32, #tpu.memory_space<vmem>>, vector<1x1x256xf32>
    %109 = vector.shape_cast %108 : vector<1x1x256xf32> to vector<1x256xf32>
    %110 = vector.broadcast %109 : vector<1x256xf32> to vector<8x256xf32>
    %111 = arith.mulf %107, %110 : vector<8x256xf32>
    %112 = arith.truncf %111 : vector<8x256xf32> to vector<8x256xbf16>
    %c8_58 = arith.constant 8 : index
    %c0_59 = arith.constant 0 : index
    %c0_60 = arith.constant 0 : index
    %113 = vector.load %arg2[%c8_58, %c0_59, %c0_60] : memref<9x8x8xbf16, #tpu.memory_space<vmem>>, vector<1x8x8xbf16>
    %114 = vector.shape_cast %113 : vector<1x8x8xbf16> to vector<8x8xbf16>
    %cst_61 = arith.constant dense<0.000000e+00> : vector<8x256xf32>
    %115 = tpu.matmul %114, %112, %cst_61 {dimension_numbers = #tpu.dot_dimension_numbers<[1], [0], [0], [1], [0, 0, 1, 1], [], []>} : vector<8x8xbf16>, vector<8x256xbf16>, vector<8x256xf32> -> vector<8x256xf32>
    %116 = arith.addf %104, %115 : vector<8x256xf32>
    %117 = vector.shape_cast %116 : vector<8x256xf32> to vector<1x8x256xf32>
    %c0_62 = arith.constant 0 : index
    %c0_63 = arith.constant 0 : index
    %c0_64 = arith.constant 0 : index
    %118 = vector.load %arg6[%c0_62, %c0_63, %c0_64] : memref<1x8x256xf32, #tpu.memory_space<vmem>>, vector<1x8x256xf32>
    tpu.vector_store %arg6[%c0_62, %c0_63, %c0_64], %117 {strides = array<i32>} : memref<1x8x256xf32, #tpu.memory_space<vmem>>, vector<1x8x256xf32>,
    %cst_65 = arith.constant dense<0.000000e+00> : vector<8xf32>
    %119 = vector.multi_reduction <add>, %116, %cst_65 [1] : vector<8x256xf32> to vector<8xf32>
    %120 = vector.shape_cast %119 : vector<8xf32> to vector<8x1xf32>
    %121 = arith.mulf %116, %116 : vector<8x256xf32>
    %cst_66 = arith.constant dense<0.000000e+00> : vector<8xf32>
    %122 = vector.multi_reduction <add>, %121, %cst_66 [1] : vector<8x256xf32> to vector<8xf32>
    %123 = vector.shape_cast %122 : vector<8xf32> to vector<8x1xf32>
    %124 = tpu.concatenate %120, %123 in 1 : vector<8x1xf32>, vector<8x1xf32> -> vector<8x2xf32>
    %125 = vector.shape_cast %124 : vector<8x2xf32> to vector<1x8x2xf32>
    %c0_67 = arith.constant 0 : index
    %c0_68 = arith.constant 0 : index
    %c0_69 = arith.constant 0 : index
    %126 = vector.load %arg7[%c0_67, %c0_68, %c0_69] : memref<1x8x2xf32, #tpu.memory_space<vmem>>, vector<1x8x2xf32>
    tpu.vector_store %arg7[%c0_67, %c0_68, %c0_69], %125 {strides = array<i32>} : memref<1x8x2xf32, #tpu.memory_space<vmem>>, vector<1x8x2xf32>,
    return
  }
  func.func @transform_0(%arg0: i32) -> (i32, i32, i32) {
    %c0_i32 = arith.constant 0 : i32
    %c0_i32_0 = arith.constant 0 : i32
    %c0_i32_1 = arith.constant 0 : i32
    return %arg0, %c0_i32, %c0_i32_0 : i32, i32, i32
  }
  func.func @transform_1(%arg0: i32) -> (i32, i32, i32) {
    %c0_i32 = arith.constant 0 : i32
    %c0_i32_0 = arith.constant 0 : i32
    %c0_i32_1 = arith.constant 0 : i32
    %c0_i32_2 = arith.constant 0 : i32
    return %c0_i32, %c0_i32_0, %c0_i32_1 : i32, i32, i32
  }
  func.func @transform_2(%arg0: i32) -> (i32, i32, i32) {
    %c0_i32 = arith.constant 0 : i32
    %c0_i32_0 = arith.constant 0 : i32
    %c0_i32_1 = arith.constant 0 : i32
    %c0_i32_2 = arith.constant 0 : i32
    return %c0_i32, %c0_i32_0, %c0_i32_1 : i32, i32, i32
  }
  func.func @transform_3(%arg0: i32) -> (i32, i32) {
    %c0_i32 = arith.constant 0 : i32
    %c0_i32_0 = arith.constant 0 : i32
    %c0_i32_1 = arith.constant 0 : i32
    return %c0_i32, %c0_i32_0 : i32, i32
  }
  func.func @transform_4(%arg0: i32) -> (i32, i32) {
    %c0_i32 = arith.constant 0 : i32
    %c0_i32_0 = arith.constant 0 : i32
    %c0_i32_1 = arith.constant 0 : i32
    return %c0_i32, %c0_i32_0 : i32, i32
  }
  func.func @transform_5(%arg0: i32) -> (i32, i32, i32) {
    %c0_i32 = arith.constant 0 : i32
    %c0_i32_0 = arith.constant 0 : i32
    %c0_i32_1 = arith.constant 0 : i32
    return %arg0, %c0_i32, %c0_i32_0 : i32, i32, i32
  }
  func.func @transform_6(%arg0: i32) -> (i32, i32, i32) {
    %c0_i32 = arith.constant 0 : i32
    %c0_i32_0 = arith.constant 0 : i32
    %c0_i32_1 = arith.constant 0 : i32
    return %arg0, %c0_i32, %c0_i32_0 : i32, i32, i32
  }
}

module attributes {stable_mosaic.version = 11 : i64} {
  func.func @_bn_relu_kernel(%arg0: i32, %arg1: memref<1x8x256xf32, #tpu.memory_space<vmem>>, %arg2: memref<8x1xf32, #tpu.memory_space<vmem>>, %arg3: memref<8x1xf32, #tpu.memory_space<vmem>>, %arg4: memref<1x8x256xf32, #tpu.memory_space<vmem>>) attributes {dimension_semantics = [#tpu.dimension_semantics<parallel>], iteration_bounds = array<i64: 2>, scalar_prefetch = 0 : i64, scratch_operands = 0 : i64, tpu.core_type = #tpu.core_type<tc>, window_params = [{transform_indices = @transform_0, window_bounds = array<i64: 1, 8, 256>}, {pipeline_mode = #tpu.pipeline_mode<synchronous>, transform_indices = @transform_1, window_bounds = array<i64: 8, 1>}, {pipeline_mode = #tpu.pipeline_mode<synchronous>, transform_indices = @transform_2, window_bounds = array<i64: 8, 1>}, {transform_indices = @transform_3, window_bounds = array<i64: 1, 8, 256>}]} {
    %c0 = arith.constant 0 : index
    %c0_0 = arith.constant 0 : index
    %c0_1 = arith.constant 0 : index
    %0 = vector.load %arg1[%c0, %c0_0, %c0_1] : memref<1x8x256xf32, #tpu.memory_space<vmem>>, vector<1x8x256xf32>
    %1 = vector.shape_cast %0 : vector<1x8x256xf32> to vector<8x256xf32>
    %c0_2 = arith.constant 0 : index
    %c0_3 = arith.constant 0 : index
    %2 = vector.load %arg2[%c0_2, %c0_3] : memref<8x1xf32, #tpu.memory_space<vmem>>, vector<8x1xf32>
    %3 = vector.broadcast %2 : vector<8x1xf32> to vector<8x256xf32>
    %4 = arith.mulf %1, %3 : vector<8x256xf32>
    %c0_4 = arith.constant 0 : index
    %c0_5 = arith.constant 0 : index
    %5 = vector.load %arg3[%c0_4, %c0_5] : memref<8x1xf32, #tpu.memory_space<vmem>>, vector<8x1xf32>
    %6 = vector.broadcast %5 : vector<8x1xf32> to vector<8x256xf32>
    %7 = arith.addf %4, %6 : vector<8x256xf32>
    %cst = arith.constant 0.000000e+00 : f32
    %8 = vector.broadcast %cst : f32 to vector<8x256xf32>
    %9 = arith.maximumf %7, %8 : vector<8x256xf32>
    %10 = vector.shape_cast %9 : vector<8x256xf32> to vector<1x8x256xf32>
    %c0_6 = arith.constant 0 : index
    %c0_7 = arith.constant 0 : index
    %c0_8 = arith.constant 0 : index
    %11 = vector.load %arg4[%c0_6, %c0_7, %c0_8] : memref<1x8x256xf32, #tpu.memory_space<vmem>>, vector<1x8x256xf32>
    tpu.vector_store %arg4[%c0_6, %c0_7, %c0_8], %10 {strides = array<i32>} : memref<1x8x256xf32, #tpu.memory_space<vmem>>, vector<1x8x256xf32>,
    return
  }
  func.func @transform_0(%arg0: i32) -> (i32, i32, i32) {
    %c0_i32 = arith.constant 0 : i32
    %c0_i32_0 = arith.constant 0 : i32
    %c0_i32_1 = arith.constant 0 : i32
    return %arg0, %c0_i32, %c0_i32_0 : i32, i32, i32
  }
  func.func @transform_1(%arg0: i32) -> (i32, i32) {
    %c0_i32 = arith.constant 0 : i32
    %c0_i32_0 = arith.constant 0 : i32
    %c0_i32_1 = arith.constant 0 : i32
    return %c0_i32, %c0_i32_0 : i32, i32
  }
  func.func @transform_2(%arg0: i32) -> (i32, i32) {
    %c0_i32 = arith.constant 0 : i32
    %c0_i32_0 = arith.constant 0 : i32
    %c0_i32_1 = arith.constant 0 : i32
    return %c0_i32, %c0_i32_0 : i32, i32
  }
  func.func @transform_3(%arg0: i32) -> (i32, i32, i32) {
    %c0_i32 = arith.constant 0 : i32
    %c0_i32_0 = arith.constant 0 : i32
    %c0_i32_1 = arith.constant 0 : i32
    return %arg0, %c0_i32, %c0_i32_0 : i32, i32, i32
  }
}

</mosaic_0001>

<bundles_post_ra>
// kernel: c2_forward.5
= control target key start
LH: loop header
LB: loop body
LE: loop exit
PB: predicated region body
PF: predicated region fallthrough
CT: control target
= control target key end

     0   :  { %s300_s12 = smov 0   ;;  %s323_s0 = inlined_call_operand.vmem [shape: f32[2,8,256], index: 0, kind: input, shape index: {}]   ;;  %s324_s1 = inlined_call_operand.vmem [shape: f32[8,1], index: 1, kind: input, shape index: {}]   ;;  %s325_s2 = inlined_call_operand.vmem [shape: f32[8,1], index: 2, kind: input, shape index: {}]   ;;  %s326_s3 = inlined_call_operand.vmem [shape: f32[2,8,256], index: 3, kind: output, shape index: {}]  }
   0x1 LB: > { %s248_s13 = sadd.s32 4294967295, %s277_s12   ;;  %p252_p0 = scmp.ge.s32.totalorder %s277_s12, 1  ;;  %s277_s12 = sphi %s300_s12, %s13_s12  }
   0x2   : > { %p137_p1 = scmp.lt.s32.totalorder %s277_s12, 3 }
   0x4   : > { %p138_p2 = pnand %p252_p0, %p137_p1 }
   0x5   : > { %v173_v0 = vld [vmem:[%s324_s1] sm:$0xff] (!%p138_p2)  ;;  %v279_v1 = vmov (!%p138_p2), 0   ;;  %p161_p3 = scmp.lt.s32.totalorder (!%p138_p2), %s248_s13, 1 }
   0x6   : > { %141 = sbr.rel (%p138_p2) target bundleno = 144 (0x90), region = 32  ;;  %270 = vset.pattern.permute.xlu0 (!%p138_p2), %v279_v1  ;;  %v181_v2 = vld [vmem:[%s325_s2] sm:$0xff] (!%p138_p2) }
   0x7   : > { %176 = vperm.xlu0 (!%p138_p2), %270, %v173_v0  }
   0xb   : > { %184 = vperm.xlu0 (!%p138_p2), %270, %v181_v2  }
   0xd   : > { %s328_s13 = smov (!%p161_p3, %s248_s13), 1 }
   0xe   : > { %s259_s18 = sshll.u32 %s328_s13, 4 }
   0xf   : > { %s165_s21 = scalar_lea.vmem %s323_s0, %s259_s18  ;;  %s170_s24 = scalar_lea.vmem %s326_s3, %s259_s18 }
  0x10   : > { %v171_v4 = vld [vmem:[%s165_s21] sm:$0xff]  ;;  %v172_v5 = vld [vmem:[%s165_s21 + $0x8] sm:$0xff] }
  0x86   : > { %v177_v3 = vpop.permute.xlu0 %176 }
  0x87   : > { %v179_v6 = vmul.f32 %v177_v3, %v171_v4  ;;  %v180_v7 = vmul.f32 %v177_v3, %v172_v5 }
  0x8a   : > { %v185_v8 = vpop.permute.xlu0 %184 }
  0x8b   : > { %v187_v9 = vadd.f32 %v185_v8, %v179_v6  ;;  %v188_v10 = vadd.f32 %v185_v8, %v180_v7 }
  0x8d   : > { %v189_v11 = vmax.f32 %v187_v9, 0.0  ;;  %v190_v12 = vmax.f32 %v188_v10, 0.0 }
  0x8f   : > { %191 = vst [vmem:[%s170_s24] sm:$0xff] %v189_v11  ;;  %192 = vst [vmem:[%s170_s24 + $0x8] sm:$0xff] %v190_v12 }
  0x90 PF: > { %s13_s12 = sadd.s32 1, %s277_s12  }
  0x91   : > { %p10_p4 = scmp.ge.s32.totalorder %s13_s12, 4  }
  0x93   :  { %12 = sbr.rel (!%p10_p4) target bundleno = 1 (0x1), region = 62 }

// kernel: c2_forward.4
= control target key start
LH: loop header
LB: loop body
LE: loop exit
PB: predicated region body
PF: predicated region fallthrough
CT: control target
= control target key end

     0   :  { %s1249_s21 = smov 0   ;;  %s1403_s0 = inlined_call_operand.vmem [shape: bf16[2,8,256], index: 0, kind: input, shape index: {}]   ;;  %s1404_s1 = inlined_call_operand.vmem [shape: bf16[9,8,8], index: 1, kind: input, shape index: {}]   ;;  %s1405_s2 = inlined_call_operand.vmem [shape: f32[9,1,256], index: 2, kind: input, shape index: {}]   ;;  %s1406_s3 = inlined_call_operand.vmem [shape: f32[8,1], index: 3, kind: input, shape index: {}]   ;;  %s1407_s4 = inlined_call_operand.vmem [shape: f32[8,1], index: 4, kind: input, shape index: {}]   ;;  %s1408_s5 = inlined_call_operand.vmem [shape: f32[2,8,256], index: 5, kind: output, shape index: {0}]   ;;  %s1409_s6 = inlined_call_operand.vmem [shape: f32[2,8,2], index: 6, kind: output, shape index: {1}]  }
   0x1 LB: > { %s1101_s22 = sadd.s32 4294967295, %s1203_s21   ;;  %p1105_p0 = scmp.ge.s32.totalorder %s1203_s21, 1  ;;  %s1203_s21 = sphi %s1249_s21, %s17_s21  }
   0x2   : > { %p215_p1 = scmp.lt.s32.totalorder %s1203_s21, 3 }
   0x4   : > { %p216_p2 = pnand %p1105_p0, %p215_p1 }
   0x5   : > { %v267_v0 = vld [vmem:[%s1406_s3] sm:$0xff] (!%p216_p2)  ;;  %v1205_v1 = vmov (!%p216_p2), 0   ;;  %p249_p3 = scmp.lt.s32.totalorder (!%p216_p2), %s1101_s22, 1  ;;  %v299_v3 = vlaneseq (!%p216_p2)  ;;  %v1125_v11 = vld [vmem:[%s1405_s2 + $0x8] sm:$0x3] (!%p216_p2)  ;;  %s1206_s9 = smov (!%p216_p2), 16  }
   0x6   : > { %219 = sbr.rel (%p216_p2) target bundleno = 675 (0x2a3), region = 40  ;;  %1196 = vset.pattern.permute.xlu0 (!%p216_p2), %v1205_v1  ;;  %667 = vmatprep.mubr.bf16.mxu0 (!%p216_p2), %v1205_v1  ;;  %v275_v2 = vld [vmem:[%s1407_s4] sm:$0xff] (!%p216_p2)  ;;  %s1207_s10 = smov (!%p216_p2), 127   ;;  %vm347_vm0 = vcmask (!%p216_p2), 1043456   ;;  %vm343_vm1 = vcmask (!%p216_p2), 64512   ;;  %vm319_vm2 = vcmask (!%p216_p2), 130048  }
   0x7   : > { %270 = vperm.xlu0 (!%p216_p2), %1196, %v267_v0   ;;  %386 = vmatprep.mubr.bf16.mxu1 (!%p216_p2), %v1205_v1  ;;  %v300_v5 = vshrl.u32 (!%p216_p2), %v299_v3, 7  ;;  %s1208_s11 = smov (!%p216_p2), 17   ;;  %v1126_v26 = vld [vmem:[%s1404_s1 + $0x10] sm:$0xf] (!%p216_p2)  ;;  %s1209_s14 = smov (!%p216_p2), 113   ;;  %vm682_vm3 = vcmask (!%p216_p2), 1039360  }
   0x8   : > { %s1210_s15 = smov (!%p216_p2), 15   ;;  %s1211_s16 = smov (!%p216_p2), 112   ;;  %v1111_v29 = vld [vmem:[%s1405_s2 + $0x2] sm:$0x3] (!%p216_p2)  ;;  %v1129_v33 = vld [vmem:[%s1405_s2 + $0xa] sm:$0x3] (!%p216_p2) }
   0x9   : > { %v1274_v9 = vsub.s32 (!%p216_p2), 1, %v300_v5  ;;  %v1276_v10 = vsub.s32 (!%p216_p2), 0, %v300_v5  ;;  %s1212_s17 = smov (!%p216_p2), 1   ;;  %s1213_s18 = smov (!%p216_p2), 111   ;;  %v297_v41 = vld [vmem:[%s1405_s2] sm:$0x3] (!%p216_p2) }
   0xa   : > { %vm292_vm4 = vcmask (!%p216_p2), 138240   ;;  %v1133_v53 = vld [vmem:[%s1405_s2 + $0xc] sm:$0x3] (!%p216_p2)  ;;  %v1112_v54 = vld [vmem:[%s1404_s1 + $0x4] sm:$0xf] (!%p216_p2)  ;;  %vm763_vm5 = vcmask (!%p216_p2), 924672  }
   0xb   : > { %278 = vperm.xlu0 (!%p216_p2), %1196, %v275_v2   ;;  %v617_v17 = vrot.slane (!%p216_p2), %v1125_v11, %v1274_v9  ;;  %v613_v18 = vrot.slane (!%p216_p2), %v1125_v11, %v1276_v10  ;;  %v330_v30 = vrot.slane (!%p216_p2), %v1111_v29, %v1276_v10  ;;  %v334_v31 = vrot.slane (!%p216_p2), %v1111_v29, %v1274_v9  ;;  %v1117_v3 = vld [vmem:[%s1405_s2 + $0x4] sm:$0x3] (!%p216_p2)  ;;  %v1121_v29 = vld [vmem:[%s1405_s2 + $0x6] sm:$0x3] (!%p216_p2) }
   0xc   : > { %v694_v38 = vrot.slane (!%p216_p2), %v1129_v33, %v1276_v10  ;;  %v698_v39 = vrot.slane (!%p216_p2), %v1129_v33, %v1274_v9  ;;  %v302_v48 = vrot.slane (!%p216_p2), %v297_v41, %v1276_v10  ;;  %v306_v52 = vrot.slane (!%p216_p2), %v297_v41, %v1274_v9 }
   0xd   : > { %s1411_s22 = smov (!%p249_p3, %s1101_s22), 1  ;;  %v775_v60 = vrot.slane %v1133_v53, %v1276_v10  ;;  %v779_v2 = vrot.slane %v1133_v53, %v1274_v9  ;;  %vm450_vm6 = vcmask 121856   ;;  %vm844_vm7 = vcmask 916480  }
   0xe   : > { %s1147_s27 = sshll.u32 %s1411_s22, 3  ;;  %vm531_vm8 = vcmask 7168   ;;  %v546_v41 = vrot.slane %v1121_v29, %v1274_v9  ;;  %vm925_vm9 = vcmask 908288   ;;  %vm1013_vm10 = vcmask 15360  }
   0xf   : > { %s253_s30 = scalar_lea.vmem %s1403_s0, %s1147_s27 }
  0x10   : > { %v264_v4 = vld [vmem:[%s253_s30] sm:$0xff] }
  0x11   : > { %v265_v6 = vunpack.c.l.bf16 %v264_v4  ;;  %v266_v7 = vunpack.c.h.bf16 %v264_v4  ;;  %v1130_v4 = vld [vmem:[%s1404_s1 + $0x14] sm:$0xf] }
  0x86   : > { %v271_v8 = vpop.permute.xlu0 %270 }
  0x87   : > { %v273_v12 = vmul.f32 %v271_v8, %v265_v6  ;;  %v274_v13 = vmul.f32 %v271_v8, %v266_v7 }
  0x8a   : > { %v279_v14 = vpop.permute.xlu0 %278 }
  0x8b   : > { %v281_v15 = vadd.f32 %v279_v14, %v273_v12  ;;  %v282_v16 = vadd.f32 %v279_v14, %v274_v13  ;;  %v461_v12 = vrot.slane %v1117_v3, %v1276_v10 }
  0x8d   : > { %v283_v19 = vmax.f32 %v281_v15, 0.0  ;;  %v284_v20 = vmax.f32 %v282_v16, 0.0  ;;  %v465_v16 = vrot.slane %v1117_v3, %v1274_v9  ;;  %v1122_v3 = vld [vmem:[%s1404_s1 + $0xc] sm:$0xf] }
  0x8f   : > { %314 = vrot.lane.b32.xlu1 %v284_v20, %s1206_s9  ;;  %678 = vrot.lane.b32.xlu0 %v283_v19, %s1207_s10  ;;  %v621_v21 = vmul.f32 %v617_v17, %v284_v20  ;;  %v620_v22 = vmul.f32 %v613_v18, %v283_v19  ;;  %v1137_v17 = vld [vmem:[%s1405_s2 + $0xe] sm:$0x3] }
  0x91   : > { %v623_v23 = vpack.c.bf16 %v621_v21, %v621_v21  ;;  %v622_v24 = vpack.c.bf16 %v620_v22, %v620_v22 }
  0x93   : > { %1127 = vmatprep.subr.msk.bf16.mxu0 %vm347_vm0, %v623_v23  ;;  %286 = vrot.lane.b32.xlu0 %v284_v20, %s1208_s11  ;;  %v630_v25 = vsel %vm347_vm0, %v622_v24, 0  ;;  %v856_v24 = vrot.slane %v1137_v17, %v1276_v10 }
  0x94   : > { %317 = vrot.lane.b32.xlu1 %v283_v19, %s1206_s9  ;;  %636 = vmatpush1.bf16.msra.mxu0 %v630_v25  ;;  %s1148_s9 = sshll.u32 %s1411_s22, 4 }
  0x95   : > { %s258_s12 = scalar_lea.vmem %s1408_s5, %s1148_s9 }
  0x97   : > { %759 = vrot.lane.b32.xlu0 %v283_v19, %s1209_s14  ;;  %1128 = vmatmul.mubr.msk.bf16.vlgmr.msra.gmra.mrb[0].mxu0 %vm343_vm1, %v1126_v26 }
  0x98   : > { %680 = vrot.lane.b32.xlu1 %v284_v20, %s1207_s10  ;;  %748 = vmatprep.mubr.bf16.mxu0 %v1205_v1 }
  0x9b   : > { %445 = vrot.lane.b32.xlu0 %v284_v20, %s1210_s15 }
  0x9c   : > { %290 = vrot.lane.b32.xlu1 %v283_v19, %s1208_s11 }
  0x9f   : > { %840 = vrot.lane.b32.xlu0 %v283_v19, %s1211_s16 }
  0xa0   : > { %761 = vrot.lane.b32.xlu1 %v284_v20, %s1209_s14 }
  0xa3   : > { %526 = vrot.lane.b32.xlu0 %v284_v20, %s1212_s17 }
  0xa4   : > { %448 = vrot.lane.b32.xlu1 %v283_v19, %s1210_s15  ;;  %s262_s15 = scalar_lea.vmem %s1409_s6, %s1147_s27 }
  0xa7   : > { %921 = vrot.lane.b32.xlu0 %v283_v19, %s1213_s18 }
  0xa8   : > { %842 = vrot.lane.b32.xlu1 %v284_v20, %s1211_s16 }
  0xac   : > { %529 = vrot.lane.b32.xlu1 %v283_v19, %s1212_s17 }
  0xb0   : > { %923 = vrot.lane.b32.xlu1 %v284_v20, %s1213_s18 }
 0x101   : > { %v315_v27 = vpop.permute.xlu1 %314  ;;  %v679_v28 = vpop.permute.xlu0 %678 }
 0x105   : > { %v287_v32 = vpop.permute.xlu0 %286 }
 0x106   : > { %v318_v34 = vpop.permute.xlu1 %317 }
 0x107   : > { %v320_v35 = vsel %vm319_vm2, %v318_v34, %v315_v27  ;;  %v323_v36 = vsel %vm319_vm2, %v315_v27, %v318_v34 }
 0x108   : > { %v337_v37 = vmul.f32 %v330_v30, %v323_v36  ;;  %v338_v40 = vmul.f32 %v334_v31, %v320_v35  ;;  %v313_v30 = vld [vmem:[%s1404_s1] sm:$0xf]  ;;  %v542_v36 = vrot.slane %v1121_v29, %v1276_v10 }
 0x109   : > { %v760_v42 = vpop.permute.xlu0 %759 }
 0x10a   : > { %v681_v43 = vpop.permute.xlu1 %680  ;;  %v340_v44 = vpack.c.bf16 %v338_v40, %v338_v40  ;;  %v339_v45 = vpack.c.bf16 %v337_v37, %v337_v37 }
 0x10b   : > { %v683_v46 = vsel %vm682_vm3, %v679_v28, %v681_v43  ;;  %v687_v47 = vsel %vm682_vm3, %v681_v43, %v679_v28  ;;  %v860_v28 = vrot.slane %v1137_v17, %v1274_v9  ;;  %v1134_v43 = vld [vmem:[%s1404_s1 + $0x18] sm:$0xf] }
 0x10c   : > { %v701_v49 = vmul.f32 %v694_v38, %v683_v46  ;;  %v702_v50 = vmul.f32 %v698_v39, %v687_v47  ;;  %1113 = vmatprep.subr.msk.bf16.mxu1 %vm347_vm0, %v340_v44  ;;  %v349_v51 = vsel %vm347_vm0, %v339_v45, 0 }
 0x10d   : > { %355 = vmatpush1.bf16.msra.mxu1 %v349_v51  ;;  %v446_v61 = vpop.permute.xlu0 %445 }
 0x10e   : > { %v703_v55 = vpack.c.bf16 %v701_v49, %v701_v49  ;;  %v704_v56 = vpack.c.bf16 %v702_v50, %v702_v50  ;;  %v291_v57 = vpop.permute.xlu1 %290 }
 0x10f   : > { %v293_v58 = vsel %vm292_vm4, %v291_v57, %v287_v32  ;;  %v296_v59 = vsel %vm292_vm4, %v287_v32, %v291_v57 }
 0x110   : > { %v309_v62 = vmul.f32 %v302_v48, %v296_v59  ;;  %v310_v63 = vmul.f32 %v306_v52, %v293_v58  ;;  %1114 = vmatmul.mubr.msk.bf16.vlgmr.msra.gmra.mrb[0].mxu1 %vm343_vm1, %v1112_v54  ;;  %1131 = vmatprep.subr.msk.bf16.mxu0 %vm347_vm0, %v704_v56  ;;  %v711_v0 = vsel %vm347_vm0, %v703_v55, 0 }
 0x111   : > { %717 = vmatpush1.bf16.msra.mxu0 %v711_v0  ;;  %436 = vmatprep.mubr.bf16.mxu1 %v1205_v1  ;;  %v841_v18 = vpop.permute.xlu0 %840  ;;  %v1138_v0 = vld [vmem:[%s1404_s1 + $0x1c] sm:$0xf] }
 0x112   : > { %v311_v5 = vpack.c.bf16 %v309_v62, %v309_v62  ;;  %v312_v6 = vpack.c.bf16 %v310_v63, %v310_v63  ;;  %v762_v7 = vpop.permute.xlu1 %761 }
 0x113   : > { %v764_v8 = vsel %vm763_vm5, %v760_v42, %v762_v7  ;;  %v768_v11 = vsel %vm763_vm5, %v762_v7, %v760_v42  ;;  %v1141_v42 = vld [vmem:[%s1405_s2 + $0x10] sm:$0x3] }
 0x114   : > { %v782_v13 = vmul.f32 %v775_v60, %v764_v8  ;;  %v783_v14 = vmul.f32 %v779_v2, %v768_v11  ;;  %1115 = vmatprep.subr.msk.bf16.mxu1 %vm347_vm0, %v312_v6  ;;  %1132 = vmatmul.mubr.msk.bf16.vlgmr.msra.gmra.mrb[0].mxu0 %vm343_vm1, %v1130_v4  ;;  %v399_v15 = vsel %vm347_vm0, %v311_v5, 0  ;;  %v937_v49 = vrot.slane %v1141_v42, %v1276_v10  ;;  %v1142_v4 = vld [vmem:[%s1404_s1 + $0x20] sm:$0xf] }
 0x115   : > { %405 = vmatpush1.bf16.msra.mxu1 %v399_v15  ;;  %829 = vmatprep.mubr.bf16.mxu0 %v1205_v1  ;;  %v527_v37 = vpop.permute.xlu0 %526  ;;  %v941_v53 = vrot.slane %v1141_v42, %v1274_v9 }
 0x116   : > { %v784_v19 = vpack.c.bf16 %v782_v13, %v782_v13  ;;  %v785_v20 = vpack.c.bf16 %v783_v14, %v783_v14  ;;  %v449_v21 = vpop.permute.xlu1 %448 }
 0x117   : > { %v451_v22 = vsel %vm450_vm6, %v449_v21, %v446_v61  ;;  %v454_v23 = vsel %vm450_vm6, %v446_v61, %v449_v21  ;;  %v1118_v61 = vld [vmem:[%s1404_s1 + $0x8] sm:$0xf] }
 0x118   : > { %v468_v25 = vmul.f32 %v461_v12, %v454_v23  ;;  %v469_v26 = vmul.f32 %v465_v16, %v451_v22  ;;  %1135 = vmatprep.subr.msk.bf16.mxu0 %vm347_vm0, %v785_v20  ;;  %v792_v27 = vsel %vm347_vm0, %v784_v19, 0 }
 0x119   : > { %798 = vmatpush1.bf16.msra.mxu0 %v792_v27  ;;  %v922_v54 = vpop.permute.xlu0 %921 }
 0x11a   : > { %v470_v31 = vpack.c.bf16 %v468_v25, %v468_v25  ;;  %v471_v32 = vpack.c.bf16 %v469_v26, %v469_v26  ;;  %v843_v33 = vpop.permute.xlu1 %842 }
 0x11b   : > { %v845_v34 = vsel %vm844_vm7, %v841_v18, %v843_v33  ;;  %v849_v35 = vsel %vm844_vm7, %v843_v33, %v841_v18 }
 0x11c   : > { %v863_v38 = vmul.f32 %v856_v24, %v845_v34  ;;  %v864_v39 = vmul.f32 %v860_v28, %v849_v35  ;;  %1116 = vmatmul.mubr.msk.bf16.vlgmr.msra.gmra.mrb[0].mxu1 %vm343_vm1, %v313_v30  ;;  %1119 = vmatprep.subr.msk.bf16.mxu1 %vm347_vm0, %v471_v32  ;;  %v478_v40 = vsel %vm347_vm0, %v470_v31, 0 }
 0x11d   : > { %484 = vmatpush1.bf16.msra.mxu1 %v478_v40  ;;  %515 = vmatprep.mubr.bf16.mxu1 %v1205_v1 }
 0x11e   : > { %v865_v44 = vpack.c.bf16 %v863_v38, %v863_v38  ;;  %v866_v45 = vpack.c.bf16 %v864_v39, %v864_v39  ;;  %v530_v46 = vpop.permute.xlu1 %529 }
 0x11f   : > { %v532_v47 = vsel %vm531_vm8, %v530_v46, %v527_v37  ;;  %v535_v48 = vsel %vm531_vm8, %v527_v37, %v530_v46 }
 0x120   : > { %v549_v50 = vmul.f32 %v542_v36, %v535_v48  ;;  %v550_v51 = vmul.f32 %v546_v41, %v532_v47  ;;  %1136 = vmatmul.mubr.msk.bf16.vlgmr.msra.gmra.mrb[0].mxu0 %vm343_vm1, %v1134_v43  ;;  %1139 = vmatprep.subr.msk.bf16.mxu0 %vm347_vm0, %v866_v45  ;;  %v873_v52 = vsel %vm347_vm0, %v865_v44, 0 }
 0x121   : > { %879 = vmatpush1.bf16.msra.mxu0 %v873_v52  ;;  %910 = vmatprep.mubr.bf16.mxu0 %v1205_v1 }
 0x122   : > { %v552_v55 = vpack.c.bf16 %v550_v51, %v550_v51  ;;  %v924_v56 = vpop.permute.xlu1 %923  ;;  %v551_v59 = vpack.c.bf16 %v549_v50, %v549_v50 }
 0x123   : > { %v926_v57 = vsel %vm925_vm9, %v922_v54, %v924_v56  ;;  %v930_v58 = vsel %vm925_vm9, %v924_v56, %v922_v54 }
 0x124   : > { %v944_v10 = vmul.f32 %v937_v49, %v926_v57  ;;  %v945_v60 = vmul.f32 %v941_v53, %v930_v58  ;;  %1123 = vmatprep.subr.msk.bf16.mxu1 %vm347_vm0, %v552_v55  ;;  %v559_v9 = vsel %vm347_vm0, %v551_v59, 0 }
 0x126   : > { %v947_v62 = vpack.c.bf16 %v945_v60, %v945_v60  ;;  %v946_v63 = vpack.c.bf16 %v944_v10, %v944_v10 }
 0x128   : > { %1120 = vmatmul.mubr.msk.bf16.vlgmr.msra.gmra.mrb[0].mxu1 %vm343_vm1, %v1118_v61  ;;  %1143 = vmatprep.subr.msk.bf16.mxu0 %vm347_vm0, %v947_v62  ;;  %v954_v2 = vsel %vm347_vm0, %v946_v63, 0 }
 0x129   : > { %565 = vmatpush1.bf16.msra.mxu1 %v559_v9  ;;  %596 = vmatprep.mubr.bf16.mxu1 %v1205_v1 }
 0x12c   : > { %1140 = vmatmul.mubr.msk.bf16.vlgmr.msra.gmra.mrb[0].mxu0 %vm343_vm1, %v1138_v0 }
 0x12d   : > { %960 = vmatpush1.bf16.msra.mxu0 %v954_v2  ;;  %991 = vmatprep.mubr.bf16.mxu0 %v1205_v1 }
 0x134   : > { %1124 = vmatmul.mubr.msk.bf16.vlgmr.msra.gmra.mrb[0].mxu1 %vm343_vm1, %v1122_v3 }
 0x138   : > { %1144 = vmatmul.mubr.msk.bf16.vlgmr.msra.gmra.mrb[0].mxu0 %vm343_vm1, %v1142_v4 }
 0x207   : > { %v598_v5 = vpop.f32.mrb[0].mxu1 }
 0x208   : > { %v600_v6 = vpop.f32.mrb[1].mxu1 }
 0x209   : > { %v602_v7 = vpop.f32.mrb[2].mxu1 }
 0x20a   : > { %v603_v8 = vpop.f32.mrb[3].mxu1 }
 0x20b   : > { %v993_v1 = vpop.f32.mrb[0].mxu0 }
 0x20c   : > { %v1149_v11 = vadd.f32 %v993_v1, %v598_v5  ;;  %v995_v12 = vpop.f32.mrb[1].mxu0 }
 0x20d   : > { %v1150_v13 = vadd.f32 %v995_v12, %v600_v6  ;;  %v997_v14 = vpop.f32.mrb[2].mxu0 }
 0x20e   : > { %1002 = vst [vmem:[%s258_s12] sm:$0xff] %v1149_v11  ;;  %v998_v15 = vpop.f32.mrb[3].mxu0  ;;  %v1007_v16 = vmul.f32 %v1149_v11, %v1149_v11 }
 0x20f   : > { %1003 = vst [vmem:[%s258_s12 + $0x8] sm:$0xff] %v1150_v13  ;;  %v1004_v17 = vadd.f32 %v1150_v13, %v1149_v11  ;;  %v1008_v18 = vmul.f32 %v1150_v13, %v1150_v13 }
 0x211   : > { %1005 = vadd.xlane.f32.xlu0 %v1004_v17  ;;  %v1009_v19 = vadd.f32 %v1008_v18, %v1007_v16 }
 0x213   : > { %1010 = vadd.xlane.f32.xlu1 %v1009_v19 }
 0x29e   : > { %v1006_v20 = vpop.xlane.xlu0 %1005 }
 0x2a0   : > { %v1011_v21 = vpop.xlane.xlu1 %1010 }
 0x2a1   : > { %v1012_v22 = vsel %vm531_vm8, %v1006_v20, %v1011_v21 }
 0x2a2   : > { %1014 = vst.msk [vmem:[%s262_s15] sm:$0xff] %vm1013_vm10, %v1012_v22 }
 0x2a3 PF: > { %s17_s21 = sadd.s32 1, %s1203_s21  }
 0x2a4   : > { %p14_p4 = scmp.ge.s32.totalorder %s17_s21, 4  }
 0x2a6   :  { %16 = sbr.rel (!%p14_p4) target bundleno = 1 (0x1), region = 98 }

// kernel: c2_forward.3
= control target key start
LH: loop header
LB: loop body
LE: loop exit
PB: predicated region body
PF: predicated region fallthrough
CT: control target
= control target key end

     0   :  { %s1240_s21 = smov 0   ;;  %s1386_s0 = inlined_call_operand.vmem [shape: f32[2,4,256], index: 0, kind: input, shape index: {}]   ;;  %s1387_s1 = inlined_call_operand.vmem [shape: bf16[9,8,4], index: 1, kind: input, shape index: {}]   ;;  %s1388_s2 = inlined_call_operand.vmem [shape: f32[9,1,256], index: 2, kind: input, shape index: {}]   ;;  %s1389_s3 = inlined_call_operand.vmem [shape: f32[4,1], index: 3, kind: input, shape index: {}]   ;;  %s1390_s4 = inlined_call_operand.vmem [shape: f32[4,1], index: 4, kind: input, shape index: {}]   ;;  %s1391_s5 = inlined_call_operand.vmem [shape: bf16[2,8,256], index: 5, kind: output, shape index: {0}]   ;;  %s1392_s6 = inlined_call_operand.vmem [shape: f32[2,8,2], index: 6, kind: output, shape index: {1}]  }
   0x1 LB: > { %s1090_s3 = sadd.s32 4294967295, %s1194_s21   ;;  %p1094_p0 = scmp.ge.s32.totalorder %s1194_s21, 1  ;;  %s1194_s21 = sphi %s1240_s21, %s17_s21  }
   0x2   : > { %p215_p1 = scmp.lt.s32.totalorder %s1194_s21, 3 }
   0x4   : > { %p216_p2 = pnand %p1094_p0, %p215_p1 }
   0x5   : > { %p249_p3 = scmp.lt.s32.totalorder (!%p216_p2), %s1090_s3, 1  ;;  %v279_v0 = vlaneseq (!%p216_p2)  ;;  %v1196_v1 = vmov (!%p216_p2), 0   ;;  %v1114_v3 = vld [vmem:[%s1388_s2 + $0x8] sm:$0x3] (!%p216_p2)  ;;  %s1197_s27 = smov (!%p216_p2), 127   ;;  %vm327_vm0 = vcmask (!%p216_p2), 1041408  }
   0x6   : > { %219 = sbr.rel (%p216_p2) target bundleno = 546 (0x222), region = 40  ;;  %649 = vmatprep.mubr.bf16.mxu0 (!%p216_p2), %v1196_v1  ;;  %366 = vmatprep.mubr.bf16.mxu1 (!%p216_p2), %v1196_v1  ;;  %s1198_s28 = smov (!%p216_p2), 16   ;;  %vm323_vm1 = vcmask (!%p216_p2), 31744   ;;  %v1115_v16 = vld [vmem:[%s1387_s1 + $0x10] sm:$0xf] (!%p216_p2)  ;;  %vm664_vm2 = vcmask (!%p216_p2), 1039360  }
   0x7   : > { %v280_v2 = vshrl.u32 (!%p216_p2), %v279_v0, 7  ;;  %s1199_s29 = smov (!%p216_p2), 17   ;;  %s1200_s8 = smov (!%p216_p2), 113   ;;  %v1118_v17 = vld [vmem:[%s1388_s2 + $0xa] sm:$0x3] (!%p216_p2)  ;;  %vm299_vm3 = vcmask (!%p216_p2), 130048  }
   0x8   : > { %s1201_s9 = smov (!%p216_p2), 15   ;;  %s1202_s10 = smov (!%p216_p2), 112   ;;  %v1100_v19 = vld [vmem:[%s1388_s2 + $0x2] sm:$0x3] (!%p216_p2)  ;;  %v277_v26 = vld [vmem:[%s1388_s2] sm:$0x3] (!%p216_p2) }
   0x9   : > { %v1255_v4 = vsub.s32 (!%p216_p2), 0, %v280_v2  ;;  %v1257_v5 = vsub.s32 (!%p216_p2), 1, %v280_v2  ;;  %s1203_s11 = smov (!%p216_p2), 1   ;;  %s1204_s12 = smov (!%p216_p2), 111   ;;  %vm272_vm4 = vcmask (!%p216_p2), 138240   ;;  %vm745_vm5 = vcmask (!%p216_p2), 924672  }
   0xa   : > { %v1122_v41 = vld [vmem:[%s1388_s2 + $0xc] sm:$0x3] (!%p216_p2)  ;;  %v1119_v48 = vld [vmem:[%s1387_s1 + $0x14] sm:$0xf] (!%p216_p2)  ;;  %v1106_v55 = vld [vmem:[%s1388_s2 + $0x4] sm:$0x3] (!%p216_p2) }
   0xb   : > { %v593_v7 = vrot.slane (!%p216_p2), %v1114_v3, %v1255_v4  ;;  %v597_v8 = vrot.slane (!%p216_p2), %v1114_v3, %v1257_v5  ;;  %v676_v21 = vrot.slane (!%p216_p2), %v1118_v17, %v1255_v4  ;;  %v680_v22 = vrot.slane (!%p216_p2), %v1118_v17, %v1257_v5  ;;  %v1101_v56 = vld [vmem:[%s1387_s1 + $0x4] sm:$0xf] (!%p216_p2) }
   0xc   : > { %v310_v24 = vrot.slane (!%p216_p2), %v1100_v19, %v1255_v4  ;;  %v314_v25 = vrot.slane (!%p216_p2), %v1100_v19, %v1257_v5  ;;  %v282_v34 = vrot.slane (!%p216_p2), %v277_v26, %v1255_v4  ;;  %v286_v35 = vrot.slane (!%p216_p2), %v277_v26, %v1257_v5  ;;  %v1110_v19 = vld [vmem:[%s1388_s2 + $0x6] sm:$0x3] (!%p216_p2) }
   0xd   : > { %s1394_s3 = smov (!%p249_p3, %s1090_s3), 1  ;;  %v598_v10 = vcombine.low %v593_v7, %v597_v8  ;;  %v757_v49 = vrot.slane %v1122_v41, %v1255_v4  ;;  %v761_v54 = vrot.slane %v1122_v41, %v1257_v5  ;;  %vm430_vm6 = vcmask 121856   ;;  %v1126_v7 = vld [vmem:[%s1388_s2 + $0xe] sm:$0x3] }
   0xe   : > { %s1253_s23 = sshll.u32 %s1394_s3, 3  ;;  %v441_v62 = vrot.slane %v1106_v55, %v1255_v4  ;;  %vm826_vm7 = vcmask 916480   ;;  %vm511_vm8 = vcmask 7168   ;;  %vm907_vm9 = vcmask 908288  }
   0xf   : > { %s253_s26 = scalar_lea.vmem %s1386_s0, %s1253_s23  ;;  %s258_s22 = scalar_lea.vmem %s1391_s5, %s1253_s23  ;;  %vm1002_vm10 = vcmask 15360  }
  0x10   : > { %v264_v6 = vld [vmem:[%s253_s26] sm:$0xff]  ;;  %s262_s26 = scalar_lea.vmem %s1392_s6, %s1253_s23 }
  0x11   : > { %660 = vrot.lane.b32.xlu1 %v264_v6, %s1197_s27  ;;  %v266_v9 = vcombine.high %v264_v6, %v264_v6  ;;  %v600_v11 = vmul.f32 %v598_v10, %v264_v6 }
  0x13   : > { %294 = vrot.lane.b32.xlu0 %v266_v9, %s1198_s28  ;;  %v602_v12 = vcombine.high %v600_v11, %v600_v11  ;;  %v604_v13 = vpack.c.bf16 %v600_v11, %v600_v11 }
  0x15   : > { %662 = vrot.lane.b32.xlu1 %v266_v9, %s1197_s27  ;;  %v605_v14 = vpack.c.bf16 %v602_v12, %v602_v12  ;;  %v612_v15 = vsel %vm327_vm0, %v604_v13, 0  ;;  %v838_v13 = vrot.slane %v1126_v7, %v1255_v4 }
  0x17   : > { %297 = vrot.lane.b32.xlu0 %v264_v6, %s1198_s28  ;;  %1116 = vmatprep.subr.msk.bf16.mxu0 %vm327_vm0, %v605_v14 }
  0x18   : > { %618 = vmatpush1.bf16.msra.mxu0 %v612_v15 }
  0x19   : > { %270 = vrot.lane.b32.xlu1 %v264_v6, %s1199_s29 }
  0x1b   : > { %267 = vrot.lane.b32.xlu0 %v266_v9, %s1199_s29  ;;  %1117 = vmatmul.mubr.msk.bf16.vlgmr.msra.gmra.mrb[0].mxu0 %vm323_vm1, %v1115_v16 }
  0x1c   : > { %730 = vmatprep.mubr.bf16.mxu0 %v1196_v1 }
  0x1d   : > { %743 = vrot.lane.b32.xlu1 %v266_v9, %s1200_s8 }
  0x1f   : > { %741 = vrot.lane.b32.xlu0 %v264_v6, %s1200_s8 }
  0x21   : > { %428 = vrot.lane.b32.xlu1 %v264_v6, %s1201_s9 }
  0x23   : > { %425 = vrot.lane.b32.xlu0 %v266_v9, %s1201_s9 }
  0x25   : > { %824 = vrot.lane.b32.xlu1 %v266_v9, %s1202_s10 }
  0x27   : > { %822 = vrot.lane.b32.xlu0 %v264_v6, %s1202_s10 }
  0x29   : > { %509 = vrot.lane.b32.xlu1 %v264_v6, %s1203_s11 }
  0x2b   : > { %506 = vrot.lane.b32.xlu0 %v266_v9, %s1203_s11 }
  0x2d   : > { %905 = vrot.lane.b32.xlu1 %v266_v9, %s1204_s12 }
  0x2f   : > { %903 = vrot.lane.b32.xlu0 %v264_v6, %s1204_s12  ;;  %v445_v6 = vrot.slane %v1106_v55, %v1257_v5 }
  0x83   : > { %v661_v18 = vpop.permute.xlu1 %660 }
  0x85   : > { %v295_v20 = vpop.permute.xlu0 %294 }
  0x87   : > { %v663_v23 = vpop.permute.xlu1 %662 }
  0x88   : > { %v665_v27 = vsel %vm664_vm2, %v661_v18, %v663_v23  ;;  %v669_v28 = vsel %vm664_vm2, %v663_v23, %v661_v18  ;;  %v842_v18 = vrot.slane %v1126_v7, %v1257_v5  ;;  %v1123_v23 = vld [vmem:[%s1387_s1 + $0x18] sm:$0xf] }
  0x89   : > { %v683_v29 = vmul.f32 %v676_v21, %v665_v27  ;;  %v684_v30 = vmul.f32 %v680_v22, %v669_v28  ;;  %v298_v31 = vpop.permute.xlu0 %297 }
  0x8a   : > { %v300_v32 = vsel %vm299_vm3, %v298_v31, %v295_v20  ;;  %v303_v33 = vsel %vm299_vm3, %v295_v20, %v298_v31  ;;  %v1130_v31 = vld [vmem:[%s1388_s2 + $0x10] sm:$0x3] }
  0x8b   : > { %v685_v36 = vpack.c.bf16 %v683_v29, %v683_v29  ;;  %v686_v37 = vpack.c.bf16 %v684_v30, %v684_v30  ;;  %v317_v38 = vmul.f32 %v310_v24, %v303_v33  ;;  %v271_v39 = vpop.permute.xlu1 %270  ;;  %v318_v40 = vmul.f32 %v314_v25, %v300_v32  ;;  %v293_v30 = vld [vmem:[%s1387_s1] sm:$0xf] }
  0x8c   : > { %v526_v29 = vrot.slane %v1110_v19, %v1257_v5 }
  0x8d   : > { %1120 = vmatprep.subr.msk.bf16.mxu0 %vm327_vm0, %v686_v37  ;;  %v693_v42 = vsel %vm327_vm0, %v685_v36, 0  ;;  %v320_v43 = vpack.c.bf16 %v318_v40, %v318_v40  ;;  %v268_v44 = vpop.permute.xlu0 %267  ;;  %v319_v45 = vpack.c.bf16 %v317_v38, %v317_v38 }
  0x8e   : > { %699 = vmatpush1.bf16.msra.mxu0 %v693_v42  ;;  %v273_v46 = vsel %vm272_vm4, %v271_v39, %v268_v44  ;;  %v276_v47 = vsel %vm272_vm4, %v268_v44, %v271_v39  ;;  %v919_v42 = vrot.slane %v1130_v31, %v1255_v4 }
  0x8f   : > { %1102 = vmatprep.subr.msk.bf16.mxu1 %vm327_vm0, %v320_v43  ;;  %v289_v50 = vmul.f32 %v282_v34, %v276_v47  ;;  %v290_v51 = vmul.f32 %v286_v35, %v273_v46  ;;  %v329_v52 = vsel %vm327_vm0, %v319_v45, 0  ;;  %v744_v53 = vpop.permute.xlu1 %743  ;;  %v522_v35 = vrot.slane %v1110_v19, %v1255_v4  ;;  %v1127_v4 = vld [vmem:[%s1387_s1 + $0x1c] sm:$0xf] }
  0x90   : > { %335 = vmatpush1.bf16.msra.mxu1 %v329_v52  ;;  %v923_v43 = vrot.slane %v1130_v31, %v1257_v5 }
  0x91   : > { %v291_v57 = vpack.c.bf16 %v289_v50, %v289_v50  ;;  %v292_v58 = vpack.c.bf16 %v290_v51, %v290_v51  ;;  %1121 = vmatmul.mubr.msk.bf16.vlgmr.msra.gmra.mrb[0].mxu0 %vm323_vm1, %v1119_v48  ;;  %v742_v59 = vpop.permute.xlu0 %741 }
  0x92   : > { %v746_v60 = vsel %vm745_vm5, %v742_v59, %v744_v53  ;;  %v750_v61 = vsel %vm745_vm5, %v744_v53, %v742_v59  ;;  %811 = vmatprep.mubr.bf16.mxu0 %v1196_v1 }
  0x93   : > { %1103 = vmatmul.mubr.msk.bf16.vlgmr.msra.gmra.mrb[0].mxu1 %vm323_vm1, %v1101_v56  ;;  %v764_v63 = vmul.f32 %v757_v49, %v746_v60  ;;  %v765_v0 = vmul.f32 %v761_v54, %v750_v61  ;;  %1104 = vmatprep.subr.msk.bf16.mxu1 %vm327_vm0, %v292_v58  ;;  %v379_v2 = vsel %vm327_vm0, %v291_v57, 0  ;;  %v429_v3 = vpop.permute.xlu1 %428  ;;  %v1107_v54 = vld [vmem:[%s1387_s1 + $0x8] sm:$0xf]  ;;  %v1131_v56 = vld [vmem:[%s1387_s1 + $0x20] sm:$0xf] }
  0x94   : > { %385 = vmatpush1.bf16.msra.mxu1 %v379_v2  ;;  %416 = vmatprep.mubr.bf16.mxu1 %v1196_v1  ;;  %v1111_v57 = vld [vmem:[%s1387_s1 + $0xc] sm:$0xf] }
  0x95   : > { %v766_v8 = vpack.c.bf16 %v764_v63, %v764_v63  ;;  %v767_v9 = vpack.c.bf16 %v765_v0, %v765_v0  ;;  %v426_v10 = vpop.permute.xlu0 %425 }
  0x96   : > { %v431_v11 = vsel %vm430_vm6, %v429_v3, %v426_v10  ;;  %v434_v12 = vsel %vm430_vm6, %v426_v10, %v429_v3 }
  0x97   : > { %1124 = vmatprep.subr.msk.bf16.mxu0 %vm327_vm0, %v767_v9  ;;  %v774_v14 = vsel %vm327_vm0, %v766_v8, 0  ;;  %v448_v15 = vmul.f32 %v441_v62, %v434_v12  ;;  %v449_v16 = vmul.f32 %v445_v6, %v431_v11  ;;  %v825_v17 = vpop.permute.xlu1 %824 }
  0x98   : > { %780 = vmatpush1.bf16.msra.mxu0 %v774_v14 }
  0x99   : > { %v450_v20 = vpack.c.bf16 %v448_v15, %v448_v15  ;;  %v451_v21 = vpack.c.bf16 %v449_v16, %v449_v16  ;;  %v823_v22 = vpop.permute.xlu0 %822 }
  0x9a   : > { %v827_v24 = vsel %vm826_vm7, %v823_v22, %v825_v17  ;;  %v831_v25 = vsel %vm826_vm7, %v825_v17, %v823_v22 }
  0x9b   : > { %v845_v26 = vmul.f32 %v838_v13, %v827_v24  ;;  %v846_v27 = vmul.f32 %v842_v18, %v831_v25  ;;  %1108 = vmatprep.subr.msk.bf16.mxu1 %vm327_vm0, %v451_v21  ;;  %v510_v28 = vpop.permute.xlu1 %509  ;;  %v458_v34 = vsel %vm327_vm0, %v450_v20, 0 }
  0x9d   : > { %1125 = vmatmul.mubr.msk.bf16.vlgmr.msra.gmra.mrb[0].mxu0 %vm323_vm1, %v1123_v23  ;;  %v847_v32 = vpack.c.bf16 %v845_v26, %v845_v26  ;;  %v848_v33 = vpack.c.bf16 %v846_v27, %v846_v27  ;;  %v507_v36 = vpop.permute.xlu0 %506 }
  0x9e   : > { %v512_v37 = vsel %vm511_vm8, %v510_v28, %v507_v36  ;;  %v515_v38 = vsel %vm511_vm8, %v507_v36, %v510_v28  ;;  %892 = vmatprep.mubr.bf16.mxu0 %v1196_v1 }
  0x9f   : > { %1105 = vmatmul.mubr.msk.bf16.vlgmr.msra.gmra.mrb[0].mxu1 %vm323_vm1, %v293_v30  ;;  %1128 = vmatprep.subr.msk.bf16.mxu0 %vm327_vm0, %v848_v33  ;;  %v855_v39 = vsel %vm327_vm0, %v847_v32, 0  ;;  %v530_v40 = vmul.f32 %v526_v29, %v512_v37  ;;  %v906_v41 = vpop.permute.xlu1 %905  ;;  %v529_v44 = vmul.f32 %v522_v35, %v515_v38 }
  0xa0   : > { %464 = vmatpush1.bf16.msra.mxu1 %v458_v34  ;;  %861 = vmatpush1.bf16.msra.mxu0 %v855_v39 }
  0xa1   : > { %v532_v45 = vpack.c.bf16 %v530_v40, %v530_v40  ;;  %495 = vmatprep.mubr.bf16.mxu1 %v1196_v1  ;;  %v904_v46 = vpop.permute.xlu0 %903  ;;  %v531_v51 = vpack.c.bf16 %v529_v44, %v529_v44 }
  0xa2   : > { %v908_v47 = vsel %vm907_vm9, %v904_v46, %v906_v41  ;;  %v912_v48 = vsel %vm907_vm9, %v906_v41, %v904_v46 }
  0xa3   : > { %v926_v49 = vmul.f32 %v919_v42, %v908_v47  ;;  %v927_v50 = vmul.f32 %v923_v43, %v912_v48  ;;  %1112 = vmatprep.subr.msk.bf16.mxu1 %vm327_vm0, %v532_v45  ;;  %v539_v55 = vsel %vm327_vm0, %v531_v51, 0 }
  0xa5   : > { %v928_v52 = vpack.c.bf16 %v926_v49, %v926_v49  ;;  %v929_v53 = vpack.c.bf16 %v927_v50, %v927_v50 }
  0xa7   : > { %1132 = vmatprep.subr.msk.bf16.mxu0 %vm327_vm0, %v929_v53  ;;  %v936_v5 = vsel %vm327_vm0, %v928_v52, 0 }
  0xa9   : > { %1129 = vmatmul.mubr.msk.bf16.vlgmr.msra.gmra.mrb[0].mxu0 %vm323_vm1, %v1127_v4 }
  0xaa   : > { %942 = vmatpush1.bf16.msra.mxu0 %v936_v5  ;;  %973 = vmatprep.mubr.bf16.mxu0 %v1196_v1 }
  0xab   : > { %1109 = vmatmul.mubr.msk.bf16.vlgmr.msra.gmra.mrb[0].mxu1 %vm323_vm1, %v1107_v54 }
  0xac   : > { %545 = vmatpush1.bf16.msra.mxu1 %v539_v55  ;;  %576 = vmatprep.mubr.bf16.mxu1 %v1196_v1 }
  0xb5   : > { %1133 = vmatmul.mubr.msk.bf16.vlgmr.msra.gmra.mrb[0].mxu0 %vm323_vm1, %v1131_v56 }
  0xb7   : > { %1113 = vmatmul.mubr.msk.bf16.vlgmr.msra.gmra.mrb[0].mxu1 %vm323_vm1, %v1111_v57 }
 0x188   : > { %v975_v58 = vpop.f32.mrb[0].mxu0 }
 0x189   : > { %v977_v59 = vpop.f32.mrb[1].mxu0 }
 0x18a   : > { %v578_v60 = vpop.f32.mrb[0].mxu1  ;;  %v979_v61 = vpop.f32.mrb[2].mxu0 }
 0x18b   : > { %v1140_v62 = vadd.f32 %v975_v58, %v578_v60  ;;  %v580_v63 = vpop.f32.mrb[1].mxu1  ;;  %v980_v1 = vpop.f32.mrb[3].mxu0 }
 0x18c   : > { %v1141_v0 = vadd.f32 %v977_v59, %v580_v63  ;;  %v582_v2 = vpop.f32.mrb[2].mxu1 }
 0x18d   : > { %v583_v3 = vpop.f32.mrb[3].mxu1  ;;  %v996_v6 = vmul.f32 %v1140_v62, %v1140_v62 }
 0x18e   : > { %v1139_v7 = vpack.c.bf16 %v1141_v0, %v1140_v62  ;;  %v993_v8 = vadd.f32 %v1141_v0, %v1140_v62  ;;  %v997_v9 = vmul.f32 %v1141_v0, %v1141_v0 }
 0x190   : > { %992 = vst [vmem:[%s258_s22] sm:$0xff] %v1139_v7  ;;  %994 = vadd.xlane.f32.xlu0 %v993_v8  ;;  %v998_v10 = vadd.f32 %v997_v9, %v996_v6 }
 0x192   : > { %999 = vadd.xlane.f32.xlu1 %v998_v10 }
 0x21d   : > { %v995_v11 = vpop.xlane.xlu0 %994 }
 0x21f   : > { %v1000_v12 = vpop.xlane.xlu1 %999 }
 0x220   : > { %v1001_v13 = vsel %vm511_vm8, %v995_v11, %v1000_v12 }
 0x221   : > { %1003 = vst.msk [vmem:[%s262_s26] sm:$0xff] %vm1002_vm10, %v1001_v13 }
 0x222 PF: > { %s17_s21 = sadd.s32 1, %s1194_s21  }
 0x223   : > { %p14_p4 = scmp.ge.s32.totalorder %s17_s21, 4  }
 0x225   :  { %16 = sbr.rel (!%p14_p4) target bundleno = 1 (0x1), region = 98 }

</bundles_post_ra>
